<compile_context>
chip_gen: v6e
topology: v6e:2x2x1
jax: 0.10.0
libtpu: 0.0.40
codegen_flags: <defaults>
</compile_context>

<pallas_src>
import functools

import jax
import jax.numpy as jnp
from jax.experimental import pallas as pl
from jax.experimental.pallas import tpu as pltpu


def _round_up(x, m):
    return ((x + m - 1) // m) * m


# ------------------------------ fused DICNet kernel ------------------------------

def _dicnet_kernel(x_ref,
                   e1w, e1b, e2w, e2b, e3w, e3b, zw, zb, g_ref, beta_ref,
                   d0w, d0b, d1w, d1b, d2w, d2b, d3w, d3b, xw, xb,
                   wev_ref, rw_ref, rb_ref,
                   z_out, xbar_out, zf_out, y_out,
                   zacc, dacc, *, true_batch):
    """One grid step = one view.  Encoder -> BN -> fusion-accumulate -> decoder.
    On the last view: fused z normalization + regression head."""
    v = pl.program_id(0)
    nv = pl.num_programs(0)

    def lin(h, w_ref, b_ref, relu=True):
        # Weights are bf16 in HBM/VMEM; compute in f32 (MXU acc f32, VPU f32).
        y = jnp.dot(h, w_ref[...].astype(jnp.float32),
                    preferred_element_type=jnp.float32) + b_ref[...]
        return jnp.maximum(y, 0.0) if relu else y

    # ---- encoder ----
    h = lin(x_ref[...], e1w, e1b)
    h = lin(h, e2w, e2b)
    h = lin(h, e3w, e3b)
    zpre = lin(h, zw, zb, relu=False)

    # ---- BatchNorm1d (training mode: batch mean, biased variance, eps=1e-5) ----
    # Statistics are computed over the TRUE batch rows only (batch is padded to 8).
    b_pad = zpre.shape[0]
    row = jax.lax.broadcasted_iota(jnp.int32, (b_pad, 1), 0)
    mask = (row < true_batch).astype(jnp.float32)
    inv_n = 1.0 / float(true_batch)
    mean = jnp.sum(zpre * mask, axis=0, keepdims=True) * inv_n
    diff = (zpre - mean) * mask
    var = jnp.sum(diff * diff, axis=0, keepdims=True) * inv_n
    z = (zpre - mean) * jax.lax.rsqrt(var + 1e-5) * g_ref[...] + beta_ref[...]
    z_out[...] = z.astype(z_out.dtype)

    # ---- weighted-fusion accumulation (scratch persists across the view grid) ----
    @pl.when(v == 0)
    def _():
        zacc[...] = jnp.zeros_like(zacc)
        dacc[...] = jnp.zeros_like(dacc)

    w_col = wev_ref[...]                     # (B_pad, 1): this view's we column
    zacc[...] += z * w_col                   # summ += diag(we[:, v]) @ z_v
    dacc[...] += w_col                       # running sum(we, axis=1)

    # ---- decoder ----
    h = lin(z, d0w, d0b)
    h = lin(h, d1w, d1b)
    h = lin(h, d2w, d2b)
    h = lin(h, d3w, d3b)
    xbar_out[...] = lin(h, xw, xb, relu=False).astype(xbar_out.dtype)

    # ---- final fusion + regression on the last view ----
    @pl.when(v == nv - 1)
    def _():
        inv = pl.reciprocal(dacc[...], approx=False)   # z = diag(1/sum(we)) @ summ
        zf = zacc[...] * inv
        zf_out[...] = zf.astype(zf_out.dtype)
        y = jnp.dot(jnp.maximum(zf, 0.0), rw_ref[...].astype(jnp.float32),
                    preferred_element_type=jnp.float32) + rb_ref[...]
        y_out[...] = y.astype(y_out.dtype)


def _dicnet_pallas_call(stacked, x_stacked, we_t, *, true_batch):
    V, B_pad, Dmax = x_stacked.shape
    n_z = stacked["z_layer"][0].shape[-1]
    nlabel = stacked["reg_w"].shape[-1]

    def vspec(arr):
        per = arr.shape[1:]
        nd = len(per)
        return pl.BlockSpec((None,) + per, lambda v, _nd=nd: (v,) + (0,) * _nd)

    def full(arr):
        nd = arr.ndim
        return pl.BlockSpec(arr.shape, lambda v, _nd=nd: (0,) * _nd)

    args, in_specs = [x_stacked], [vspec(x_stacked)]
    for name in ("enc_1", "enc_2", "enc_3", "z_layer"):
        w, b = stacked[name]
        args += [w, b]
        in_specs += [vspec(w), vspec(b)]
    args += [stacked["bn_gamma"], stacked["bn_beta"]]
    in_specs += [vspec(stacked["bn_gamma"]), vspec(stacked["bn_beta"])]
    for name in ("dec_0", "dec_1", "dec_2", "dec_3", "x_bar"):
        w, b = stacked[name]
        args += [w, b]
        in_specs += [vspec(w), vspec(b)]
    args += [we_t, stacked["reg_w"], stacked["reg_b"]]
    in_specs += [vspec(we_t), full(stacked["reg_w"]), full(stacked["reg_b"])]

    out_shape = (
        jax.ShapeDtypeStruct((V, B_pad, n_z), jnp.float32),    # per-view z
        jax.ShapeDtypeStruct((V, B_pad, Dmax), jnp.float32),   # per-view x_bar
        jax.ShapeDtypeStruct((B_pad, n_z), jnp.float32),       # fused z
        jax.ShapeDtypeStruct((B_pad, nlabel), jnp.float32),    # regression output
    )
    out_specs = (
        pl.BlockSpec((None, B_pad, n_z), lambda v: (v, 0, 0)),
        pl.BlockSpec((None, B_pad, Dmax), lambda v: (v, 0, 0)),
        pl.BlockSpec((B_pad, n_z), lambda v: (0, 0)),
        pl.BlockSpec((B_pad, nlabel), lambda v: (0, 0)),
    )

    return pl.pallas_call(
        functools.partial(_dicnet_kernel, true_batch=true_batch),
        grid=(V,),
        out_shape=out_shape,
        in_specs=in_specs,
        out_specs=out_specs,
        scratch_shapes=[pltpu.VMEM((B_pad, n_z), jnp.float32),   # fusion accumulator
                        pltpu.VMEM((B_pad, 1), jnp.float32)],    # sum(we) accumulator
        compiler_params=pltpu.CompilerParams(
            # View axis carries VMEM scratch across steps -> must be serial.
            dimension_semantics=("arbitrary",)),
    )(*args)


# --------------------------------- parameter setup ---------------------------------

def compute_dims(n_stacks, n_input):
    dims = []
    for n_dim in n_input:
        d = [int(round(n_dim * 0.8)) for _ in range(n_stacks - 2)]
        d.append(1500)
        dims.append(d)
    return dims


def _init_linear(key, n_in, n_out):
    # xavier_uniform_ weight, stored pre-transposed (in, out); small random bias (1, out).
    kw, kb = jax.random.split(key)
    limit = (6.0 / (n_in + n_out)) ** 0.5
    w_t = jax.random.uniform(kw, (n_in, n_out), jnp.float32, -limit, limit)
    # Round-trip through bf16 so the bf16 HBM copy and the f32 reference agree exactly.
    w_t = w_t.astype(jnp.bfloat16).astype(jnp.float32)
    b = jax.random.uniform(kb, (1, n_out), jnp.float32, -0.05, 0.05)
    return w_t, b


def build_params(key, n_stacks, n_input, n_z, nlabel):
    dims = compute_dims(n_stacks, n_input)
    params = {"views": []}
    for v, n_dim in enumerate(n_input):
        dv = dims[v]
        key, *ks = jax.random.split(key, 10)
        view = {
            "enc_1": _init_linear(ks[0], n_dim, dv[0]),
            "enc_2": _init_linear(ks[1], dv[0], dv[1]),
            "enc_3": _init_linear(ks[2], dv[1], dv[2]),
            "z_layer": _init_linear(ks[3], dv[2], n_z),
            "bn_gamma": jnp.ones((1, n_z), jnp.float32),
            "bn_beta": jnp.zeros((1, n_z), jnp.float32),
            "dec_0": _init_linear(ks[4], n_z, n_z),
            "dec_1": _init_linear(ks[5], n_z, dv[2]),
            "dec_2": _init_linear(ks[6], dv[2], dv[1]),
            "dec_3": _init_linear(ks[7], dv[1], dv[0]),
            "x_bar": _init_linear(ks[8], dv[0], n_dim),
        }
        params["views"].append(view)
    key, kreg = jax.random.split(key)
    params["regression"] = _init_linear(kreg, n_z, nlabel)
    return params, dims


def stack_view_params(params, n_input, dims):
    """Zero-pad per-view weights to common shapes, stack along a view axis, bf16 weights."""
    Dmax = max(n_input)
    D0 = max(d[0] for d in dims)
    D1 = max(d[1] for d in dims)
    D2 = _round_up(max(d[2] for d in dims), 128)   # 1500 -> 1536 (lane aligned)
    n_z = params["views"][0]["z_layer"][0].shape[1]

    target = {
        "enc_1": (Dmax, D0), "enc_2": (D0, D1), "enc_3": (D1, D2), "z_layer": (D2, n_z),
        "dec_0": (n_z, n_z), "dec_1": (n_z, D2), "dec_2": (D2, D1), "dec_3": (D1, D0),
        "x_bar": (D0, Dmax),
    }

    def pad2(a, shape):
        return jnp.pad(a, [(0, s - d) for d, s in zip(a.shape, shape)])

    stacked = {}
    for name, (ti, to) in target.items():
        ws, bs = [], []
        for view in params["views"]:
            w, b = view[name]
            ws.append(pad2(w, (ti, to)))
            bs.append(pad2(b, (1, to)))
        stacked[name] = (jnp.stack(ws).astype(jnp.bfloat16), jnp.stack(bs))
    stacked["bn_gamma"] = jnp.stack([v["bn_gamma"] for v in params["views"]])
    stacked["bn_beta"] = jnp.stack([v["bn_beta"] for v in params["views"]])
    rw, rb = params["regression"]
    stacked["reg_w"] = rw.astype(jnp.bfloat16)
    stacked["reg_b"] = rb
    return stacked, Dmax


# ----------------------------------- forward pass -----------------------------------

@functools.partial(jax.jit, static_argnums=(3, 4))
def dicnet_forward(stacked, mul_X, we, n_input, Dmax):
    V = len(n_input)
    B = mul_X[0].shape[0]
    B_pad = _round_up(B, 8)                         # full sublane tile

    # One-shot input prep (fused by XLA inside this jit): pad batch + feature dims.
    xs = [jnp.pad(x, ((0, B_pad - B), (0, Dmax - x.shape[1]))) for x in mul_X]
    x_stacked = jnp.stack(xs)
    we_p = jnp.pad(we, ((0, B_pad - B), (0, 0)), constant_values=1.0)
    we_t = jnp.transpose(we_p)[:, :, None]          # (V, B_pad, 1)

    zs, xbars, zf, y = _dicnet_pallas_call(stacked, x_stacked, we_t, true_batch=B)

    x_bar_list = [xbars[v, :B, :n_input[v]] for v in range(V)]
    individual_zs = [zs[v, :B] for v in range(V)]
    return x_bar_list, y[:B], zf[:B], individual_zs


# ------------------------------- pure-JAX reference -------------------------------

def _ref_linear(x, w_t, b, relu=False, pre_relu=False):
    if pre_relu:
        x = jnp.maximum(x, 0.0)
    y = x @ w_t + b
    return jnp.maximum(y, 0.0) if relu else y


def _ref_bn(x):
    m = jnp.mean(x, axis=0, keepdims=True)
    v = jnp.mean(jnp.square(x - m), axis=0, keepdims=True)
    return (x - m) / jnp.sqrt(v + 1e-5)


def reference_forward(params, mul_X, we):
    zs = []
    for p, x in zip(params["views"], mul_X):
        h = _ref_linear(x, *p["enc_1"], relu=True)
        h = _ref_linear(h, *p["enc_2"], relu=True)
        h = _ref_linear(h, *p["enc_3"], relu=True)
        zs.append(_ref_bn(_ref_linear(h, *p["z_layer"])))
    summ = sum(we[:, i:i + 1] * zi for i, zi in enumerate(zs))
    z = summ / jnp.sum(we, axis=1, keepdims=True)
    x_bars = []
    for p, zi in zip(params["views"], zs):
        h = _ref_linear(zi, *p["dec_0"], relu=True)
        h = _ref_linear(h, *p["dec_1"], relu=True)
        h = _ref_linear(h, *p["dec_2"], relu=True)
        h = _ref_linear(h, *p["dec_3"], relu=True)
        x_bars.append(_ref_linear(h, *p["x_bar"]))
    y = _ref_linear(z, *params["regression"], pre_relu=True)
    return x_bars, y, z, zs


# -------------------------------------- main --------------------------------------

if __name__ == "__main__":
    n_stacks, n_input, n_z, nlabel = 4, (20, 24), 8, 5
    batch = 6

    key = jax.random.PRNGKey(0)
    kp, kx0, kx1, kw = jax.random.split(key, 4)
    params, dims = build_params(kp, n_stacks, list(n_input), n_z, nlabel)
    stacked, Dmax = stack_view_params(params, list(n_input), dims)

    mul_X = (
        jax.random.normal(kx0, (batch, n_input[0]), jnp.float32),
        jax.random.normal(kx1, (batch, n_input[1]), jnp.float32),
    )
    # View-availability weights (strictly positive so 1/sum(we) is finite).
    we = jax.random.uniform(kw, (batch, len(n_input)), jnp.float32, 0.5, 1.5)

    out = dicnet_forward(stacked, mul_X, we, n_input, Dmax)
    out = jax.block_until_ready(out)

    ref = reference_forward(params, list(mul_X), we)
    x_bar_list, y_label, z, zs = out
    rx, ry, rz, rzs = ref
    for a, b in zip(x_bar_list, rx):
        assert jnp.allclose(a, b, atol=1e-3, rtol=1e-3)
    assert jnp.allclose(y_label, ry, atol=1e-3, rtol=1e-3)
    assert jnp.allclose(z, rz, atol=1e-3, rtol=1e-3)
    for a, b in zip(zs, rzs):
        assert jnp.allclose(a, b, atol=1e-3, rtol=1e-3)

    print("KERNEL_OK")
</pallas_src>

<mosaic_0001>
module attributes {stable_mosaic.version = 11 : i64} {
  func.func @_dicnet_kernel(%arg0: i32, %arg1: memref<1x8x24xf32, #tpu.memory_space<vmem>>, %arg2: memref<1x24x19xbf16, #tpu.memory_space<vmem>>, %arg3: memref<1x1x19xf32, #tpu.memory_space<vmem>>, %arg4: memref<1x19x19xbf16, #tpu.memory_space<vmem>>, %arg5: memref<1x1x19xf32, #tpu.memory_space<vmem>>, %arg6: memref<1x19x1536xbf16, #tpu.memory_space<vmem>>, %arg7: memref<1x1x1536xf32, #tpu.memory_space<vmem>>, %arg8: memref<1x1536x8xbf16, #tpu.memory_space<vmem>>, %arg9: memref<1x1x8xf32, #tpu.memory_space<vmem>>, %arg10: memref<1x1x8xf32, #tpu.memory_space<vmem>>, %arg11: memref<1x1x8xf32, #tpu.memory_space<vmem>>, %arg12: memref<1x8x8xbf16, #tpu.memory_space<vmem>>, %arg13: memref<1x1x8xf32, #tpu.memory_space<vmem>>, %arg14: memref<1x8x1536xbf16, #tpu.memory_space<vmem>>, %arg15: memref<1x1x1536xf32, #tpu.memory_space<vmem>>, %arg16: memref<1x1536x19xbf16, #tpu.memory_space<vmem>>, %arg17: memref<1x1x19xf32, #tpu.memory_space<vmem>>, %arg18: memref<1x19x19xbf16, #tpu.memory_space<vmem>>, %arg19: memref<1x1x19xf32, #tpu.memory_space<vmem>>, %arg20: memref<1x19x24xbf16, #tpu.memory_space<vmem>>, %arg21: memref<1x1x24xf32, #tpu.memory_space<vmem>>, %arg22: memref<1x8x1xf32, #tpu.memory_space<vmem>>, %arg23: memref<8x5xbf16, #tpu.memory_space<vmem>>, %arg24: memref<1x5xf32, #tpu.memory_space<vmem>>, %arg25: memref<1x8x8xf32, #tpu.memory_space<vmem>>, %arg26: memref<1x8x24xf32, #tpu.memory_space<vmem>>, %arg27: memref<8x8xf32, #tpu.memory_space<vmem>>, %arg28: memref<8x5xf32, #tpu.memory_space<vmem>>, %arg29: memref<8x8xf32, #tpu.memory_space<vmem>>, %arg30: memref<8x1xf32, #tpu.memory_space<vmem>>) attributes {dimension_semantics = [#tpu.dimension_semantics<arbitrary>], iteration_bounds = array<i64: 2>, scalar_prefetch = 0 : i64, scratch_operands = 2 : i64, tpu.core_type = #tpu.core_type<tc>, window_params = [{transform_indices = @transform_0, window_bounds = array<i64: 1, 8, 24>}, {transform_indices = @transform_1, window_bounds = array<i64: 1, 24, 19>}, {transform_indices = @transform_2, window_bounds = array<i64: 1, 1, 19>}, {transform_indices = @transform_3, window_bounds = array<i64: 1, 19, 19>}, {transform_indices = @transform_4, window_bounds = array<i64: 1, 1, 19>}, {transform_indices = @transform_5, window_bounds = array<i64: 1, 19, 1536>}, {transform_indices = @transform_6, window_bounds = array<i64: 1, 1, 1536>}, {transform_indices = @transform_7, window_bounds = array<i64: 1, 1536, 8>}, {transform_indices = @transform_8, window_bounds = array<i64: 1, 1, 8>}, {transform_indices = @transform_9, window_bounds = array<i64: 1, 1, 8>}, {transform_indices = @transform_10, window_bounds = array<i64: 1, 1, 8>}, {transform_indices = @transform_11, window_bounds = array<i64: 1, 8, 8>}, {transform_indices = @transform_12, window_bounds = array<i64: 1, 1, 8>}, {transform_indices = @transform_13, window_bounds = array<i64: 1, 8, 1536>}, {transform_indices = @transform_14, window_bounds = array<i64: 1, 1, 1536>}, {transform_indices = @transform_15, window_bounds = array<i64: 1, 1536, 19>}, {transform_indices = @transform_16, window_bounds = array<i64: 1, 1, 19>}, {transform_indices = @transform_17, window_bounds = array<i64: 1, 19, 19>}, {transform_indices = @transform_18, window_bounds = array<i64: 1, 1, 19>}, {transform_indices = @transform_19, window_bounds = array<i64: 1, 19, 24>}, {transform_indices = @transform_20, window_bounds = array<i64: 1, 1, 24>}, {transform_indices = @transform_21, window_bounds = array<i64: 1, 8, 1>}, {pipeline_mode = #tpu.pipeline_mode<synchronous>, transform_indices = @transform_22, window_bounds = array<i64: 8, 5>}, {pipeline_mode = #tpu.pipeline_mode<synchronous>, transform_indices = @transform_23, window_bounds = array<i64: 1, 5>}, {transform_indices = @transform_24, window_bounds = array<i64: 1, 8, 8>}, {transform_indices = @transform_25, window_bounds = array<i64: 1, 8, 24>}, {pipeline_mode = #tpu.pipeline_mode<synchronous>, transform_indices = @transform_26, window_bounds = array<i64: 8, 8>}, {pipeline_mode = #tpu.pipeline_mode<synchronous>, transform_indices = @transform_27, window_bounds = array<i64: 8, 5>}]} {
    %c0 = arith.constant 0 : index
    %c0_0 = arith.constant 0 : index
    %c0_1 = arith.constant 0 : index
    %0 = vector.load %arg1[%c0, %c0_0, %c0_1] : memref<1x8x24xf32, #tpu.memory_space<vmem>>, vector<1x8x24xf32>
    %1 = vector.shape_cast %0 : vector<1x8x24xf32> to vector<8x24xf32>
    %c0_2 = arith.constant 0 : index
    %c0_3 = arith.constant 0 : index
    %c0_4 = arith.constant 0 : index
    %2 = vector.load %arg2[%c0_2, %c0_3, %c0_4] : memref<1x24x19xbf16, #tpu.memory_space<vmem>>, vector<1x24x19xbf16>
    %3 = vector.shape_cast %2 : vector<1x24x19xbf16> to vector<24x19xbf16>
    %4 = arith.extf %3 : vector<24x19xbf16> to vector<24x19xf32>
    %cst = arith.constant dense<0.000000e+00> : vector<8x19xf32>
    %5 = tpu.matmul %1, %4, %cst {dimension_numbers = #tpu.dot_dimension_numbers<[1], [0], [0], [1], [0, 0, 1, 1], [], []>} : vector<8x24xf32>, vector<24x19xf32>, vector<8x19xf32> -> vector<8x19xf32>
    %c0_5 = arith.constant 0 : index
    %c0_6 = arith.constant 0 : index
    %c0_7 = arith.constant 0 : index
    %6 = vector.load %arg3[%c0_5, %c0_6, %c0_7] : memref<1x1x19xf32, #tpu.memory_space<vmem>>, vector<1x1x19xf32>
    %7 = vector.shape_cast %6 : vector<1x1x19xf32> to vector<1x19xf32>
    %8 = vector.broadcast %7 : vector<1x19xf32> to vector<8x19xf32>
    %9 = arith.addf %5, %8 : vector<8x19xf32>
    %cst_8 = arith.constant 0.000000e+00 : f32
    %10 = vector.broadcast %cst_8 : f32 to vector<8x19xf32>
    %11 = arith.maximumf %9, %10 : vector<8x19xf32>
    %c0_9 = arith.constant 0 : index
    %c0_10 = arith.constant 0 : index
    %c0_11 = arith.constant 0 : index
    %12 = vector.load %arg4[%c0_9, %c0_10, %c0_11] : memref<1x19x19xbf16, #tpu.memory_space<vmem>>, vector<1x19x19xbf16>
    %13 = vector.shape_cast %12 : vector<1x19x19xbf16> to vector<19x19xbf16>
    %14 = arith.extf %13 : vector<19x19xbf16> to vector<19x19xf32>
    %cst_12 = arith.constant dense<0.000000e+00> : vector<8x19xf32>
    %15 = tpu.matmul %11, %14, %cst_12 {dimension_numbers = #tpu.dot_dimension_numbers<[1], [0], [0], [1], [0, 0, 1, 1], [], []>} : vector<8x19xf32>, vector<19x19xf32>, vector<8x19xf32> -> vector<8x19xf32>
    %c0_13 = arith.constant 0 : index
    %c0_14 = arith.constant 0 : index
    %c0_15 = arith.constant 0 : index
    %16 = vector.load %arg5[%c0_13, %c0_14, %c0_15] : memref<1x1x19xf32, #tpu.memory_space<vmem>>, vector<1x1x19xf32>
    %17 = vector.shape_cast %16 : vector<1x1x19xf32> to vector<1x19xf32>
    %18 = vector.broadcast %17 : vector<1x19xf32> to vector<8x19xf32>
    %19 = arith.addf %15, %18 : vector<8x19xf32>
    %cst_16 = arith.constant 0.000000e+00 : f32
    %20 = vector.broadcast %cst_16 : f32 to vector<8x19xf32>
    %21 = arith.maximumf %19, %20 : vector<8x19xf32>
    %c0_17 = arith.constant 0 : index
    %c0_18 = arith.constant 0 : index
    %c0_19 = arith.constant 0 : index
    %22 = vector.load %arg6[%c0_17, %c0_18, %c0_19] : memref<1x19x1536xbf16, #tpu.memory_space<vmem>>, vector<1x19x1536xbf16>
    %23 = vector.shape_cast %22 : vector<1x19x1536xbf16> to vector<19x1536xbf16>
    %24 = arith.extf %23 : vector<19x1536xbf16> to vector<19x1536xf32>
    %cst_20 = arith.constant dense<0.000000e+00> : vector<8x1536xf32>
    %25 = tpu.matmul %21, %24, %cst_20 {dimension_numbers = #tpu.dot_dimension_numbers<[1], [0], [0], [1], [0, 0, 1, 1], [], []>} : vector<8x19xf32>, vector<19x1536xf32>, vector<8x1536xf32> -> vector<8x1536xf32>
    %c0_21 = arith.constant 0 : index
    %c0_22 = arith.constant 0 : index
    %c0_23 = arith.constant 0 : index
    %26 = vector.load %arg7[%c0_21, %c0_22, %c0_23] : memref<1x1x1536xf32, #tpu.memory_space<vmem>>, vector<1x1x1536xf32>
    %27 = vector.shape_cast %26 : vector<1x1x1536xf32> to vector<1x1536xf32>
    %28 = vector.broadcast %27 : vector<1x1536xf32> to vector<8x1536xf32>
    %29 = arith.addf %25, %28 : vector<8x1536xf32>
    %cst_24 = arith.constant 0.000000e+00 : f32
    %30 = vector.broadcast %cst_24 : f32 to vector<8x1536xf32>
    %31 = arith.maximumf %29, %30 : vector<8x1536xf32>
    %c0_25 = arith.constant 0 : index
    %c0_26 = arith.constant 0 : index
    %c0_27 = arith.constant 0 : index
    %32 = vector.load %arg8[%c0_25, %c0_26, %c0_27] : memref<1x1536x8xbf16, #tpu.memory_space<vmem>>, vector<1x1536x8xbf16>
    %33 = vector.shape_cast %32 : vector<1x1536x8xbf16> to vector<1536x8xbf16>
    %34 = arith.extf %33 : vector<1536x8xbf16> to vector<1536x8xf32>
    %cst_28 = arith.constant dense<0.000000e+00> : vector<8x8xf32>
    %35 = tpu.matmul %31, %34, %cst_28 {dimension_numbers = #tpu.dot_dimension_numbers<[1], [0], [0], [1], [0, 0, 1, 1], [], []>} : vector<8x1536xf32>, vector<1536x8xf32>, vector<8x8xf32> -> vector<8x8xf32>
    %c0_29 = arith.constant 0 : index
    %c0_30 = arith.constant 0 : index
    %c0_31 = arith.constant 0 : index
    %36 = vector.load %arg9[%c0_29, %c0_30, %c0_31] : memref<1x1x8xf32, #tpu.memory_space<vmem>>, vector<1x1x8xf32>
    %37 = vector.shape_cast %36 : vector<1x1x8xf32> to vector<1x8xf32>
    %38 = vector.broadcast %37 : vector<1x8xf32> to vector<8x8xf32>
    %39 = arith.addf %35, %38 : vector<8x8xf32>
    %40 = tpu.iota {dimensions = array<i32: 0>} : vector<8x1xi32>
    %c6_i32 = arith.constant 6 : i32
    %41 = vector.broadcast %c6_i32 : i32 to vector<8x1xi32>
    %42 = arith.cmpi slt, %40, %41 : vector<8x1xi32>
    %43 = arith.extui %42 : vector<8x1xi1> to vector<8x1xi32>
    %44 = arith.sitofp %43 : vector<8x1xi32> to vector<8x1xf32>
    %45 = vector.broadcast %44 : vector<8x1xf32> to vector<8x8xf32>
    %46 = arith.mulf %39, %45 : vector<8x8xf32>
    %cst_32 = arith.constant dense<0.000000e+00> : vector<8xf32>
    %47 = vector.multi_reduction <add>, %46, %cst_32 [0] : vector<8x8xf32> to vector<8xf32>
    %48 = vector.shape_cast %47 : vector<8xf32> to vector<1x8xf32>
    %cst_33 = arith.constant 0.166666672 : f32
    %49 = vector.broadcast %cst_33 : f32 to vector<1x8xf32>
    %50 = arith.mulf %48, %49 : vector<1x8xf32>
    %51 = vector.broadcast %50 : vector<1x8xf32> to vector<8x8xf32>
    %52 = arith.subf %39, %51 : vector<8x8xf32>
    %53 = vector.broadcast %44 : vector<8x1xf32> to vector<8x8xf32>
    %54 = arith.mulf %52, %53 : vector<8x8xf32>
    %55 = arith.mulf %54, %54 : vector<8x8xf32>
    %cst_34 = arith.constant dense<0.000000e+00> : vector<8xf32>
    %56 = vector.multi_reduction <add>, %55, %cst_34 [0] : vector<8x8xf32> to vector<8xf32>
    %57 = vector.shape_cast %56 : vector<8xf32> to vector<1x8xf32>
    %cst_35 = arith.constant 0.166666672 : f32
    %58 = vector.broadcast %cst_35 : f32 to vector<1x8xf32>
    %59 = arith.mulf %57, %58 : vector<1x8xf32>
    %60 = vector.broadcast %50 : vector<1x8xf32> to vector<8x8xf32>
    %61 = arith.subf %39, %60 : vector<8x8xf32>
    %cst_36 = arith.constant 9.99999974E-6 : f32
    %62 = vector.broadcast %cst_36 : f32 to vector<1x8xf32>
    %63 = arith.addf %59, %62 : vector<1x8xf32>
    %64 = math.rsqrt %63 : vector<1x8xf32>
    %65 = vector.broadcast %64 : vector<1x8xf32> to vector<8x8xf32>
    %66 = arith.mulf %61, %65 : vector<8x8xf32>
    %c0_37 = arith.constant 0 : index
    %c0_38 = arith.constant 0 : index
    %c0_39 = arith.constant 0 : index
    %67 = vector.load %arg10[%c0_37, %c0_38, %c0_39] : memref<1x1x8xf32, #tpu.memory_space<vmem>>, vector<1x1x8xf32>
    %68 = vector.shape_cast %67 : vector<1x1x8xf32> to vector<1x8xf32>
    %69 = vector.broadcast %68 : vector<1x8xf32> to vector<8x8xf32>
    %70 = arith.mulf %66, %69 : vector<8x8xf32>
    %c0_40 = arith.constant 0 : index
    %c0_41 = arith.constant 0 : index
    %c0_42 = arith.constant 0 : index
    %71 = vector.load %arg11[%c0_40, %c0_41, %c0_42] : memref<1x1x8xf32, #tpu.memory_space<vmem>>, vector<1x1x8xf32>
    %72 = vector.shape_cast %71 : vector<1x1x8xf32> to vector<1x8xf32>
    %73 = vector.broadcast %72 : vector<1x8xf32> to vector<8x8xf32>
    %74 = arith.addf %70, %73 : vector<8x8xf32>
    %c0_43 = arith.constant 0 : index
    %c0_44 = arith.constant 0 : index
    %c0_45 = arith.constant 0 : index
    %75 = vector.load %arg25[%c0_43, %c0_44, %c0_45] : memref<1x8x8xf32, #tpu.memory_space<vmem>>, vector<1x8x8xf32>
    %76 = vector.shape_cast %75 : vector<1x8x8xf32> to vector<8x8xf32>
    %77 = vector.shape_cast %74 : vector<8x8xf32> to vector<1x8x8xf32>
    tpu.vector_store %arg25[%c0_43, %c0_44, %c0_45], %77 {strides = array<i32>} : memref<1x8x8xf32, #tpu.memory_space<vmem>>, vector<1x8x8xf32>,
    %c0_i32 = arith.constant 0 : i32
    %78 = arith.cmpi eq, %arg0, %c0_i32 : i32
    %79 = arith.extui %78 : i1 to i32
    %c0_i32_46 = arith.constant 0 : i32
    %80 = arith.cmpi ne, %79, %c0_i32_46 : i32
    scf.if %80 {
      %cst_101 = arith.constant 0.000000e+00 : f32
      %145 = vector.broadcast %cst_101 : f32 to vector<8x8xf32>
      %c0_102 = arith.constant 0 : index
      %c0_103 = arith.constant 0 : index
      %146 = vector.load %arg29[%c0_102, %c0_103] : memref<8x8xf32, #tpu.memory_space<vmem>>, vector<8x8xf32>
      tpu.vector_store %arg29[%c0_102, %c0_103], %145 {strides = array<i32>} : memref<8x8xf32, #tpu.memory_space<vmem>>, vector<8x8xf32>,
      %cst_104 = arith.constant 0.000000e+00 : f32
      %147 = vector.broadcast %cst_104 : f32 to vector<8x1xf32>
      %c0_105 = arith.constant 0 : index
      %c0_106 = arith.constant 0 : index
      %148 = vector.load %arg30[%c0_105, %c0_106] : memref<8x1xf32, #tpu.memory_space<vmem>>, vector<8x1xf32>
      tpu.vector_store %arg30[%c0_105, %c0_106], %147 {strides = array<i32>} : memref<8x1xf32, #tpu.memory_space<vmem>>, vector<8x1xf32>,
    } else {
    }
    %c0_47 = arith.constant 0 : index
    %c0_48 = arith.constant 0 : index
    %c0_49 = arith.constant 0 : index
    %81 = vector.load %arg22[%c0_47, %c0_48, %c0_49] : memref<1x8x1xf32, #tpu.memory_space<vmem>>, vector<1x8x1xf32>
    %82 = vector.shape_cast %81 : vector<1x8x1xf32> to vector<8x1xf32>
    %c0_50 = arith.constant 0 : index
    %c0_51 = arith.constant 0 : index
    %83 = vector.load %arg29[%c0_50, %c0_51] : memref<8x8xf32, #tpu.memory_space<vmem>>, vector<8x8xf32>
    %84 = vector.broadcast %82 : vector<8x1xf32> to vector<8x8xf32>
    %85 = arith.mulf %74, %84 : vector<8x8xf32>
    %86 = arith.addf %83, %85 : vector<8x8xf32>
    %c0_52 = arith.constant 0 : index
    %c0_53 = arith.constant 0 : index
    %87 = vector.load %arg29[%c0_52, %c0_53] : memref<8x8xf32, #tpu.memory_space<vmem>>, vector<8x8xf32>
    tpu.vector_store %arg29[%c0_52, %c0_53], %86 {strides = array<i32>} : memref<8x8xf32, #tpu.memory_space<vmem>>, vector<8x8xf32>,
    %c0_54 = arith.constant 0 : index
    %c0_55 = arith.constant 0 : index
    %88 = vector.load %arg30[%c0_54, %c0_55] : memref<8x1xf32, #tpu.memory_space<vmem>>, vector<8x1xf32>
    %89 = arith.addf %88, %82 : vector<8x1xf32>
    %c0_56 = arith.constant 0 : index
    %c0_57 = arith.constant 0 : index
    %90 = vector.load %arg30[%c0_56, %c0_57] : memref<8x1xf32, #tpu.memory_space<vmem>>, vector<8x1xf32>
    tpu.vector_store %arg30[%c0_56, %c0_57], %89 {strides = array<i32>} : memref<8x1xf32, #tpu.memory_space<vmem>>, vector<8x1xf32>,
    %c0_58 = arith.constant 0 : index
    %c0_59 = arith.constant 0 : index
    %c0_60 = arith.constant 0 : index
    %91 = vector.load %arg12[%c0_58, %c0_59, %c0_60] : memref<1x8x8xbf16, #tpu.memory_space<vmem>>, vector<1x8x8xbf16>
    %92 = vector.shape_cast %91 : vector<1x8x8xbf16> to vector<8x8xbf16>
    %93 = arith.extf %92 : vector<8x8xbf16> to vector<8x8xf32>
    %cst_61 = arith.constant dense<0.000000e+00> : vector<8x8xf32>
    %94 = tpu.matmul %74, %93, %cst_61 {dimension_numbers = #tpu.dot_dimension_numbers<[1], [0], [0], [1], [0, 0, 1, 1], [], []>} : vector<8x8xf32>, vector<8x8xf32>, vector<8x8xf32> -> vector<8x8xf32>
    %c0_62 = arith.constant 0 : index
    %c0_63 = arith.constant 0 : index
    %c0_64 = arith.constant 0 : index
    %95 = vector.load %arg13[%c0_62, %c0_63, %c0_64] : memref<1x1x8xf32, #tpu.memory_space<vmem>>, vector<1x1x8xf32>
    %96 = vector.shape_cast %95 : vector<1x1x8xf32> to vector<1x8xf32>
    %97 = vector.broadcast %96 : vector<1x8xf32> to vector<8x8xf32>
    %98 = arith.addf %94, %97 : vector<8x8xf32>
    %cst_65 = arith.constant 0.000000e+00 : f32
    %99 = vector.broadcast %cst_65 : f32 to vector<8x8xf32>
    %100 = arith.maximumf %98, %99 : vector<8x8xf32>
    %c0_66 = arith.constant 0 : index
    %c0_67 = arith.constant 0 : index
    %c0_68 = arith.constant 0 : index
    %101 = vector.load %arg14[%c0_66, %c0_67, %c0_68] : memref<1x8x1536xbf16, #tpu.memory_space<vmem>>, vector<1x8x1536xbf16>
    %102 = vector.shape_cast %101 : vector<1x8x1536xbf16> to vector<8x1536xbf16>
    %103 = arith.extf %102 : vector<8x1536xbf16> to vector<8x1536xf32>
    %cst_69 = arith.constant dense<0.000000e+00> : vector<8x1536xf32>
    %104 = tpu.matmul %100, %103, %cst_69 {dimension_numbers = #tpu.dot_dimension_numbers<[1], [0], [0], [1], [0, 0, 1, 1], [], []>} : vector<8x8xf32>, vector<8x1536xf32>, vector<8x1536xf32> -> vector<8x1536xf32>
    %c0_70 = arith.constant 0 : index
    %c0_71 = arith.constant 0 : index
    %c0_72 = arith.constant 0 : index
    %105 = vector.load %arg15[%c0_70, %c0_71, %c0_72] : memref<1x1x1536xf32, #tpu.memory_space<vmem>>, vector<1x1x1536xf32>
    %106 = vector.shape_cast %105 : vector<1x1x1536xf32> to vector<1x1536xf32>
    %107 = vector.broadcast %106 : vector<1x1536xf32> to vector<8x1536xf32>
    %108 = arith.addf %104, %107 : vector<8x1536xf32>
    %cst_73 = arith.constant 0.000000e+00 : f32
    %109 = vector.broadcast %cst_73 : f32 to vector<8x1536xf32>
    %110 = arith.maximumf %108, %109 : vector<8x1536xf32>
    %c0_74 = arith.constant 0 : index
    %c0_75 = arith.constant 0 : index
    %c0_76 = arith.constant 0 : index
    %111 = vector.load %arg16[%c0_74, %c0_75, %c0_76] : memref<1x1536x19xbf16, #tpu.memory_space<vmem>>, vector<1x1536x19xbf16>
    %112 = vector.shape_cast %111 : vector<1x1536x19xbf16> to vector<1536x19xbf16>
    %113 = arith.extf %112 : vector<1536x19xbf16> to vector<1536x19xf32>
    %cst_77 = arith.constant dense<0.000000e+00> : vector<8x19xf32>
    %114 = tpu.matmul %110, %113, %cst_77 {dimension_numbers = #tpu.dot_dimension_numbers<[1], [0], [0], [1], [0, 0, 1, 1], [], []>} : vector<8x1536xf32>, vector<1536x19xf32>, vector<8x19xf32> -> vector<8x19xf32>
    %c0_78 = arith.constant 0 : index
    %c0_79 = arith.constant 0 : index
    %c0_80 = arith.constant 0 : index
    %115 = vector.load %arg17[%c0_78, %c0_79, %c0_80] : memref<1x1x19xf32, #tpu.memory_space<vmem>>, vector<1x1x19xf32>
    %116 = vector.shape_cast %115 : vector<1x1x19xf32> to vector<1x19xf32>
    %117 = vector.broadcast %116 : vector<1x19xf32> to vector<8x19xf32>
    %118 = arith.addf %114, %117 : vector<8x19xf32>
    %cst_81 = arith.constant 0.000000e+00 : f32
    %119 = vector.broadcast %cst_81 : f32 to vector<8x19xf32>
    %120 = arith.maximumf %118, %119 : vector<8x19xf32>
    %c0_82 = arith.constant 0 : index
    %c0_83 = arith.constant 0 : index
    %c0_84 = arith.constant 0 : index
    %121 = vector.load %arg18[%c0_82, %c0_83, %c0_84] : memref<1x19x19xbf16, #tpu.memory_space<vmem>>, vector<1x19x19xbf16>
    %122 = vector.shape_cast %121 : vector<1x19x19xbf16> to vector<19x19xbf16>
    %123 = arith.extf %122 : vector<19x19xbf16> to vector<19x19xf32>
    %cst_85 = arith.constant dense<0.000000e+00> : vector<8x19xf32>
    %124 = tpu.matmul %120, %123, %cst_85 {dimension_numbers = #tpu.dot_dimension_numbers<[1], [0], [0], [1], [0, 0, 1, 1], [], []>} : vector<8x19xf32>, vector<19x19xf32>, vector<8x19xf32> -> vector<8x19xf32>
    %c0_86 = arith.constant 0 : index
    %c0_87 = arith.constant 0 : index
    %c0_88 = arith.constant 0 : index
    %125 = vector.load %arg19[%c0_86, %c0_87, %c0_88] : memref<1x1x19xf32, #tpu.memory_space<vmem>>, vector<1x1x19xf32>
    %126 = vector.shape_cast %125 : vector<1x1x19xf32> to vector<1x19xf32>
    %127 = vector.broadcast %126 : vector<1x19xf32> to vector<8x19xf32>
    %128 = arith.addf %124, %127 : vector<8x19xf32>
    %cst_89 = arith.constant 0.000000e+00 : f32
    %129 = vector.broadcast %cst_89 : f32 to vector<8x19xf32>
    %130 = arith.maximumf %128, %129 : vector<8x19xf32>
    %c0_90 = arith.constant 0 : index
    %c0_91 = arith.constant 0 : index
    %c0_92 = arith.constant 0 : index
    %131 = vector.load %arg20[%c0_90, %c0_91, %c0_92] : memref<1x19x24xbf16, #tpu.memory_space<vmem>>, vector<1x19x24xbf16>
    %132 = vector.shape_cast %131 : vector<1x19x24xbf16> to vector<19x24xbf16>
    %133 = arith.extf %132 : vector<19x24xbf16> to vector<19x24xf32>
    %cst_93 = arith.constant dense<0.000000e+00> : vector<8x24xf32>
    %134 = tpu.matmul %130, %133, %cst_93 {dimension_numbers = #tpu.dot_dimension_numbers<[1], [0], [0], [1], [0, 0, 1, 1], [], []>} : vector<8x19xf32>, vector<19x24xf32>, vector<8x24xf32> -> vector<8x24xf32>
    %c0_94 = arith.constant 0 : index
    %c0_95 = arith.constant 0 : index
    %c0_96 = arith.constant 0 : index
    %135 = vector.load %arg21[%c0_94, %c0_95, %c0_96] : memref<1x1x24xf32, #tpu.memory_space<vmem>>, vector<1x1x24xf32>
    %136 = vector.shape_cast %135 : vector<1x1x24xf32> to vector<1x24xf32>
    %137 = vector.broadcast %136 : vector<1x24xf32> to vector<8x24xf32>
    %138 = arith.addf %134, %137 : vector<8x24xf32>
    %c0_97 = arith.constant 0 : index
    %c0_98 = arith.constant 0 : index
    %c0_99 = arith.constant 0 : index
    %139 = vector.load %arg26[%c0_97, %c0_98, %c0_99] : memref<1x8x24xf32, #tpu.memory_space<vmem>>, vector<1x8x24xf32>
    %140 = vector.shape_cast %139 : vector<1x8x24xf32> to vector<8x24xf32>
    %141 = vector.shape_cast %138 : vector<8x24xf32> to vector<1x8x24xf32>
    tpu.vector_store %arg26[%c0_97, %c0_98, %c0_99], %141 {strides = array<i32>} : memref<1x8x24xf32, #tpu.memory_space<vmem>>, vector<1x8x24xf32>,
    %c1_i32 = arith.constant 1 : i32
    %142 = arith.cmpi eq, %arg0, %c1_i32 : i32
    %143 = arith.extui %142 : i1 to i32
    %c0_i32_100 = arith.constant 0 : i32
    %144 = arith.cmpi ne, %143, %c0_i32_100 : i32
    scf.if %144 {
      %c0_101 = arith.constant 0 : index
      %c0_102 = arith.constant 0 : index
      %145 = vector.load %arg30[%c0_101, %c0_102] : memref<8x1xf32, #tpu.memory_space<vmem>>, vector<8x1xf32>
      %146 = tpu.reciprocal %145 : vector<8x1xf32> -> vector<8x1xf32>
      %c0_103 = arith.constant 0 : index
      %c0_104 = arith.constant 0 : index
      %147 = vector.load %arg29[%c0_103, %c0_104] : memref<8x8xf32, #tpu.memory_space<vmem>>, vector<8x8xf32>
      %148 = vector.broadcast %146 : vector<8x1xf32> to vector<8x8xf32>
      %149 = arith.mulf %147, %148 : vector<8x8xf32>
      %c0_105 = arith.constant 0 : index
      %c0_106 = arith.constant 0 : index
      %150 = vector.load %arg27[%c0_105, %c0_106] : memref<8x8xf32, #tpu.memory_space<vmem>>, vector<8x8xf32>
      tpu.vector_store %arg27[%c0_105, %c0_106], %149 {strides = array<i32>} : memref<8x8xf32, #tpu.memory_space<vmem>>, vector<8x8xf32>,
      %cst_107 = arith.constant 0.000000e+00 : f32
      %151 = vector.broadcast %cst_107 : f32 to vector<8x8xf32>
      %152 = arith.maximumf %149, %151 : vector<8x8xf32>
      %c0_108 = arith.constant 0 : index
      %c0_109 = arith.constant 0 : index
      %153 = vector.load %arg23[%c0_108, %c0_109] : memref<8x5xbf16, #tpu.memory_space<vmem>>, vector<8x5xbf16>
      %154 = arith.extf %153 : vector<8x5xbf16> to vector<8x5xf32>
      %cst_110 = arith.constant dense<0.000000e+00> : vector<8x5xf32>
      %155 = tpu.matmul %152, %154, %cst_110 {dimension_numbers = #tpu.dot_dimension_numbers<[1], [0], [0], [1], [0, 0, 1, 1], [], []>} : vector<8x8xf32>, vector<8x5xf32>, vector<8x5xf32> -> vector<8x5xf32>
      %c0_111 = arith.constant 0 : index
      %c0_112 = arith.constant 0 : index
      %156 = vector.load %arg24[%c0_111, %c0_112] : memref<1x5xf32, #tpu.memory_space<vmem>>, vector<1x5xf32>
      %157 = vector.broadcast %156 : vector<1x5xf32> to vector<8x5xf32>
      %158 = arith.addf %155, %157 : vector<8x5xf32>
      %c0_113 = arith.constant 0 : index
      %c0_114 = arith.constant 0 : index
      %159 = vector.load %arg28[%c0_113, %c0_114] : memref<8x5xf32, #tpu.memory_space<vmem>>, vector<8x5xf32>
      tpu.vector_store %arg28[%c0_113, %c0_114], %158 {strides = array<i32>} : memref<8x5xf32, #tpu.memory_space<vmem>>, vector<8x5xf32>,
    } else {
    }
    return
  }
  func.func @transform_0(%arg0: i32) -> (i32, i32, i32) {
    %c0_i32 = arith.constant 0 : i32
    %c0_i32_0 = arith.constant 0 : i32
    %c0_i32_1 = arith.constant 0 : i32
    return %arg0, %c0_i32, %c0_i32_0 : i32, i32, i32
  }
  func.func @transform_1(%arg0: i32) -> (i32, i32, i32) {
    %c0_i32 = arith.constant 0 : i32
    %c0_i32_0 = arith.constant 0 : i32
    %c0_i32_1 = arith.constant 0 : i32
    return %arg0, %c0_i32, %c0_i32_0 : i32, i32, i32
  }
  func.func @transform_2(%arg0: i32) -> (i32, i32, i32) {
    %c0_i32 = arith.constant 0 : i32
    %c0_i32_0 = arith.constant 0 : i32
    %c0_i32_1 = arith.constant 0 : i32
    return %arg0, %c0_i32, %c0_i32_0 : i32, i32, i32
  }
  func.func @transform_3(%arg0: i32) -> (i32, i32, i32) {
    %c0_i32 = arith.constant 0 : i32
    %c0_i32_0 = arith.constant 0 : i32
    %c0_i32_1 = arith.constant 0 : i32
    return %arg0, %c0_i32, %c0_i32_0 : i32, i32, i32
  }
  func.func @transform_4(%arg0: i32) -> (i32, i32, i32) {
    %c0_i32 = arith.constant 0 : i32
    %c0_i32_0 = arith.constant 0 : i32
    %c0_i32_1 = arith.constant 0 : i32
    return %arg0, %c0_i32, %c0_i32_0 : i32, i32, i32
  }
  func.func @transform_5(%arg0: i32) -> (i32, i32, i32) {
    %c0_i32 = arith.constant 0 : i32
    %c0_i32_0 = arith.constant 0 : i32
    %c0_i32_1 = arith.constant 0 : i32
    return %arg0, %c0_i32, %c0_i32_0 : i32, i32, i32
  }
  func.func @transform_6(%arg0: i32) -> (i32, i32, i32) {
    %c0_i32 = arith.constant 0 : i32
    %c0_i32_0 = arith.constant 0 : i32
    %c0_i32_1 = arith.constant 0 : i32
    return %arg0, %c0_i32, %c0_i32_0 : i32, i32, i32
  }
  func.func @transform_7(%arg0: i32) -> (i32, i32, i32) {
    %c0_i32 = arith.constant 0 : i32
    %c0_i32_0 = arith.constant 0 : i32
    %c0_i32_1 = arith.constant 0 : i32
    return %arg0, %c0_i32, %c0_i32_0 : i32, i32, i32
  }
  func.func @transform_8(%arg0: i32) -> (i32, i32, i32) {
    %c0_i32 = arith.constant 0 : i32
    %c0_i32_0 = arith.constant 0 : i32
    %c0_i32_1 = arith.constant 0 : i32
    return %arg0, %c0_i32, %c0_i32_0 : i32, i32, i32
  }
  func.func @transform_9(%arg0: i32) -> (i32, i32, i32) {
    %c0_i32 = arith.constant 0 : i32
    %c0_i32_0 = arith.constant 0 : i32
    %c0_i32_1 = arith.constant 0 : i32
    return %arg0, %c0_i32, %c0_i32_0 : i32, i32, i32
  }
  func.func @transform_10(%arg0: i32) -> (i32, i32, i32) {
    %c0_i32 = arith.constant 0 : i32
    %c0_i32_0 = arith.constant 0 : i32
    %c0_i32_1 = arith.constant 0 : i32
    return %arg0, %c0_i32, %c0_i32_0 : i32, i32, i32
  }
  func.func @transform_11(%arg0: i32) -> (i32, i32, i32) {
    %c0_i32 = arith.constant 0 : i32
    %c0_i32_0 = arith.constant 0 : i32
    %c0_i32_1 = arith.constant 0 : i32
    return %arg0, %c0_i32, %c0_i32_0 : i32, i32, i32
  }
  func.func @transform_12(%arg0: i32) -> (i32, i32, i32) {
    %c0_i32 = arith.constant 0 : i32
    %c0_i32_0 = arith.constant 0 : i32
    %c0_i32_1 = arith.constant 0 : i32
    return %arg0, %c0_i32, %c0_i32_0 : i32, i32, i32
  }
  func.func @transform_13(%arg0: i32) -> (i32, i32, i32) {
    %c0_i32 = arith.constant 0 : i32
    %c0_i32_0 = arith.constant 0 : i32
    %c0_i32_1 = arith.constant 0 : i32
    return %arg0, %c0_i32, %c0_i32_0 : i32, i32, i32
  }
  func.func @transform_14(%arg0: i32) -> (i32, i32, i32) {
    %c0_i32 = arith.constant 0 : i32
    %c0_i32_0 = arith.constant 0 : i32
    %c0_i32_1 = arith.constant 0 : i32
    return %arg0, %c0_i32, %c0_i32_0 : i32, i32, i32
  }
  func.func @transform_15(%arg0: i32) -> (i32, i32, i32) {
    %c0_i32 = arith.constant 0 : i32
    %c0_i32_0 = arith.constant 0 : i32
    %c0_i32_1 = arith.constant 0 : i32
    return %arg0, %c0_i32, %c0_i32_0 : i32, i32, i32
  }
  func.func @transform_16(%arg0: i32) -> (i32, i32, i32) {
    %c0_i32 = arith.constant 0 : i32
    %c0_i32_0 = arith.constant 0 : i32
    %c0_i32_1 = arith.constant 0 : i32
    return %arg0, %c0_i32, %c0_i32_0 : i32, i32, i32
  }
  func.func @transform_17(%arg0: i32) -> (i32, i32, i32) {
    %c0_i32 = arith.constant 0 : i32
    %c0_i32_0 = arith.constant 0 : i32
    %c0_i32_1 = arith.constant 0 : i32
    return %arg0, %c0_i32, %c0_i32_0 : i32, i32, i32
  }
  func.func @transform_18(%arg0: i32) -> (i32, i32, i32) {
    %c0_i32 = arith.constant 0 : i32
    %c0_i32_0 = arith.constant 0 : i32
    %c0_i32_1 = arith.constant 0 : i32
    return %arg0, %c0_i32, %c0_i32_0 : i32, i32, i32
  }
  func.func @transform_19(%arg0: i32) -> (i32, i32, i32) {
    %c0_i32 = arith.constant 0 : i32
    %c0_i32_0 = arith.constant 0 : i32
    %c0_i32_1 = arith.constant 0 : i32
    return %arg0, %c0_i32, %c0_i32_0 : i32, i32, i32
  }
  func.func @transform_20(%arg0: i32) -> (i32, i32, i32) {
    %c0_i32 = arith.constant 0 : i32
    %c0_i32_0 = arith.constant 0 : i32
    %c0_i32_1 = arith.constant 0 : i32
    return %arg0, %c0_i32, %c0_i32_0 : i32, i32, i32
  }
  func.func @transform_21(%arg0: i32) -> (i32, i32, i32) {
    %c0_i32 = arith.constant 0 : i32
    %c0_i32_0 = arith.constant 0 : i32
    %c0_i32_1 = arith.constant 0 : i32
    return %arg0, %c0_i32, %c0_i32_0 : i32, i32, i32
  }
  func.func @transform_22(%arg0: i32) -> (i32, i32) {
    %c0_i32 = arith.constant 0 : i32
    %c0_i32_0 = arith.constant 0 : i32
    %c0_i32_1 = arith.constant 0 : i32
    return %c0_i32, %c0_i32_0 : i32, i32
  }
  func.func @transform_23(%arg0: i32) -> (i32, i32) {
    %c0_i32 = arith.constant 0 : i32
    %c0_i32_0 = arith.constant 0 : i32
    %c0_i32_1 = arith.constant 0 : i32
    return %c0_i32, %c0_i32_0 : i32, i32
  }
  func.func @transform_24(%arg0: i32) -> (i32, i32, i32) {
    %c0_i32 = arith.constant 0 : i32
    %c0_i32_0 = arith.constant 0 : i32
    %c0_i32_1 = arith.constant 0 : i32
    return %arg0, %c0_i32, %c0_i32_0 : i32, i32, i32
  }
  func.func @transform_25(%arg0: i32) -> (i32, i32, i32) {
    %c0_i32 = arith.constant 0 : i32
    %c0_i32_0 = arith.constant 0 : i32
    %c0_i32_1 = arith.constant 0 : i32
    return %arg0, %c0_i32, %c0_i32_0 : i32, i32, i32
  }
  func.func @transform_26(%arg0: i32) -> (i32, i32) {
    %c0_i32 = arith.constant 0 : i32
    %c0_i32_0 = arith.constant 0 : i32
    %c0_i32_1 = arith.constant 0 : i32
    return %c0_i32, %c0_i32_0 : i32, i32
  }
  func.func @transform_27(%arg0: i32) -> (i32, i32) {
    %c0_i32 = arith.constant 0 : i32
    %c0_i32_0 = arith.constant 0 : i32
    %c0_i32_1 = arith.constant 0 : i32
    return %c0_i32, %c0_i32_0 : i32, i32
  }
}

</mosaic_0001>

<bundles_post_ra>
// kernel: dicnet_forward.1
= control target key start
LH: loop header
LB: loop body
LE: loop exit
PB: predicated region body
PF: predicated region fallthrough
CT: control target
= control target key end

     0   :  { %s7293_s0 = inlined_call_operand.vmem [shape: f32[2,8,24], index: 0, kind: input, shape index: {}]   ;;  %s7294_s1 = inlined_call_operand.vmem [shape: bf16[2,24,19], index: 1, kind: input, shape index: {}]   ;;  %s7295_s2 = inlined_call_operand.vmem [shape: f32[2,1,19], index: 2, kind: input, shape index: {}]   ;;  %s7296_s3 = inlined_call_operand.vmem [shape: bf16[2,19,19], index: 3, kind: input, shape index: {}]   ;;  %s7297_s4 = inlined_call_operand.vmem [shape: f32[2,1,19], index: 4, kind: input, shape index: {}]   ;;  %s7298_s5 = inlined_call_operand.vmem [shape: bf16[2,19,1536], index: 5, kind: input, shape index: {}]   ;;  %s7299_s6 = inlined_call_operand.vmem [shape: f32[2,1,1536], index: 6, kind: input, shape index: {}]   ;;  %s7300_s7 = inlined_call_operand.vmem [shape: bf16[2,1536,8], index: 7, kind: input, shape index: {}]   ;;  %s7301_s8 = inlined_call_operand.vmem [shape: f32[2,1,8], index: 8, kind: input, shape index: {}]   ;;  %s7302_s9 = inlined_call_operand.vmem [shape: f32[2,1,8], index: 9, kind: input, shape index: {}]   ;;  %s7303_s10 = inlined_call_operand.vmem [shape: f32[2,1,8], index: 10, kind: input, shape index: {}]   ;;  %s7304_s11 = inlined_call_operand.vmem [shape: bf16[2,8,8], index: 11, kind: input, shape index: {}]   ;;  %s7305_s12 = inlined_call_operand.vmem [shape: f32[2,1,8], index: 12, kind: input, shape index: {}]   ;;  %s7306_s13 = inlined_call_operand.vmem [shape: bf16[2,8,1536], index: 13, kind: input, shape index: {}]   ;;  %s7307_s14 = inlined_call_operand.vmem [shape: f32[2,1,1536], index: 14, kind: input, shape index: {}]   ;;  %s7308_s15 = inlined_call_operand.vmem [shape: bf16[2,1536,19], index: 15, kind: input, shape index: {}]   ;;  %s7309_s16 = inlined_call_operand.vmem [shape: f32[2,1,19], index: 16, kind: input, shape index: {}]   ;;  %s7310_s17 = inlined_call_operand.vmem [shape: bf16[2,19,19], index: 17, kind: input, shape index: {}]   ;;  %s7311_s18 = inlined_call_operand.vmem [shape: f32[2,1,19], index: 18, kind: input, shape index: {}]   ;;  %s7312_s19 = inlined_call_operand.vmem [shape: bf16[2,19,24], index: 19, kind: input, shape index: {}]   ;;  %s7313_s20 = inlined_call_operand.vmem [shape: f32[2,1,24], index: 20, kind: input, shape index: {}]   ;;  %s7314_s21 = inlined_call_operand.vmem [shape: f32[2,8,1], index: 21, kind: input, shape index: {}]   ;;  %s7315_s22 = inlined_call_operand.vmem [shape: bf16[8,5], index: 22, kind: input, shape index: {}]   ;;  %s7316_s23 = inlined_call_operand.vmem [shape: f32[1,5], index: 23, kind: input, shape index: {}]   ;;  %s7317_s24 = inlined_call_operand.vmem [shape: f32[2,8,8], index: 24, kind: output, shape index: {0}]   ;;  %s7318_s25 = inlined_call_operand.vmem [shape: f32[2,8,24], index: 25, kind: output, shape index: {1}]   ;;  %s7319_s26 = inlined_call_operand.hbm [shape: f32[8,8], index: 26, kind: output, shape index: {2}]   ;;  %s7320_s27 = inlined_call_operand.hbm [shape: f32[8,5], index: 27, kind: output, shape index: {3}]  }
   0x1   :  { %7322 = sst [smem:[#allocation11_spill]] %s7293_s0 }
   0x2   :  { %7323 = sst [smem:[#allocation12_spill]] %s7294_s1 }
   0x3   :  { %7324 = sst [smem:[#allocation13_spill]] %s7295_s2 }
   0x4   :  { %7325 = sst [smem:[#allocation14_spill]] %s7296_s3 }
   0x5   :  { %7326 = sst [smem:[#allocation15_spill]] %s7297_s4 }
   0x6   :  { %7327 = sst [smem:[#allocation16_spill]] %s7298_s5 }
   0x7   :  { %7328 = sst [smem:[#allocation17_spill]] %s7299_s6 }
   0x8   :  { %7329 = sst [smem:[#allocation18_spill]] %s7300_s7 }
   0x9   :  { %7330 = sst [smem:[#allocation19_spill]] %s7301_s8 }
   0xa   :  { %7331 = sst [smem:[#allocation20_spill]] %s7302_s9 }
   0xb   :  { %7332 = sst [smem:[#allocation21_spill]] %s7303_s10 }
   0xc   :  { %7333 = sst [smem:[#allocation22_spill]] %s7304_s11 }
   0xd   :  { %7334 = sst [smem:[#allocation23_spill]] %s7306_s13 }
   0xe   :  { %7335 = sst [smem:[#allocation24_spill]] %s7307_s14 }
   0xf   :  { %7336 = sst [smem:[#allocation25_spill]] %s7308_s15 }
  0x10   :  { %7337 = sst [smem:[#allocation26_spill]] %s7310_s17 }
  0x11   :  { %7338 = sst [smem:[#allocation27_spill]] %s7315_s22 }
  0x12   :  { %7339 = sst [smem:[#allocation28_spill]] %s7316_s23 }
  0x13   :  { %7340 = sst [smem:[#allocation29_spill]] %s7319_s26 }
  0x14   :  { %7341 = sst [smem:[#allocation30_spill]] %s7320_s27 }
  0x15   :  { %33 = vsyncpa [#allocation5], 0 }
  0x16   :  { %34 = vsyncpa [#allocation7], 0  ;;  %s6663_s7 = smov 0  }
  0x17 LB: > { %7342 = sst [smem:[#allocation10_spill]] %s6512_s7  ;;  %s6669_s4 = sadd.s32 4294967295, %s6512_s7   ;;  %s6512_s7 = sphi %s6663_s7, %s40_s7  }
  0x18   : > { %p4885_p0 = scmp.ge.s32.totalorder %s6512_s7, 1  ;;  %p923_p1 = scmp.lt.s32.totalorder %s6512_s7, 3 }
  0x1a   : > { %p924_p2 = pnand %p4885_p0, %p923_p1 }
  0x1b   : > { %p1080_p3 = scmp.lt.s32.totalorder (!%p924_p2), %s6669_s4, 1  ;;  %s7343_s10 = sld [smem:[#allocation22_spill]] (!%p924_p2) }
  0x1c   : > { %927 = sbr.rel (%p924_p2) target bundleno = 2408 (0x968), region = 116  ;;  %s7344_s11 = sld [smem:[#allocation12_spill]] (!%p924_p2) }
  0x1d   : > { %s7345_s14 = sld [smem:[#allocation24_spill]] (!%p924_p2)  ;;  %p4926_p4 = scmp.ne.s32.totalorder (!%p924_p2), %s6669_s4, 0 }
  0x1e   : > { %s7347_s15 = sld [smem:[#allocation25_spill]] (!%p924_p2) }
  0x1f   : > { %s7348_s13 = sld [smem:[#allocation23_spill]] (!%p924_p2) }
  0x20   : > { %s7349_s17 = sld [smem:[#allocation26_spill]] (!%p924_p2) }
  0x21   : > { %v6514_v0 = vmov 0.0   ;;  %vm6515_vm0 = vmmov 0   ;;  %s6678_s8 = scalar_select %p1080_p3, %s6669_s4, 1  ;;  %vm1189_vm1 = vcmask 195584   ;;  %vm1281_vm2 = vcmask 1042432  }
  0x22   : > { %6365 = vmatprep.subr.mxu0 %v6514_v0  ;;  %6371 = vmatprep.mubr.msk.f32.mxu0 %vm6515_vm0, %v6514_v0  ;;  %s7350_s0 = sld [smem:[#allocation11_spill]]  ;;  %vm1277_vm3 = vcmask 154624   ;;  %vm2768_vm5 = vcmask 64512  }
  0x23   : > { %6374 = vmatprep.subr.mxu1 %v6514_v0  ;;  %6380 = vmatprep.mubr.msk.f32.mxu1 %vm6515_vm0, %v6514_v0  ;;  %s6684_s30 = smul.u32 12, %s6678_s8  ;;  %s4891_s9 = sshll.u32 %s6678_s8, 2 }
  0x24   : > { %s6691_s29 = scalar_lea.vmem %s7343_s10, %s4891_s9  ;;  %s6414_s26 = smul.u32 48, %s6678_s8 }
  0x25   : > { %s1088_s2 = scalar_lea.vmem %s7344_s11, %s6684_s30  ;;  %s6706_s28 = scalar_lea.vmem %s7345_s14, %s6684_s30 }
  0x26   : > { %v4952_v1 = vld [vmem:[%s1088_s2] sm:$0xff]   ;;  %v1178_v2 = vld [vmem:[%s1088_s2 + $0x8] sm:$0xf]  ;;  %s7346_s9 = smul.u32 768, %s6678_s8  ;;  %s6718_s11 = scalar_lea.vmem %s7348_s13, %s6414_s26 }
  0x27   : > { %v1181_v3 = vunpack.c.l.bf16 %v1178_v2  ;;  %v4954_v4 = vunpack.c.h.bf16 %v4952_v1  ;;  %s6728_s14 = scalar_lea.vmem %s7349_s17, %s6684_s30  ;;  %v4953_v5 = vunpack.c.l.bf16 %v4952_v1  ;;  %s6738_s26 = scalar_lea.vmem %s7312_s19, %s6684_s30 }
  0x28   : > { %s6713_s1 = scalar_lea.vmem %s7347_s15, %s7346_s9  ;;  %s6746_s23 = sshll.u32 %s6678_s8, 3 }
  0x29   : > { %6366 = vmatpush3.msra.mxu0 %v1181_v3  ;;  %s1083_s10 = scalar_lea.vmem %s7350_s0, %s6746_s23  ;;  %s1166_s6 = scalar_lea.vmem %s7314_s21, %s6746_s23 }
  0x2a   : > { %6367 = vmatprep.subr.mxu0 %v6514_v0  ;;  %s1174_s27 = scalar_lea.vmem %s7318_s25, %s6746_s23  ;;  %v1175_v6 = vld [vmem:[%s1083_s10] sm:$0xff]  ;;  %s7351_s17 = sld [smem:[#allocation14_spill]] }
  0x2b   : > { %6368 = vmatpush3.msra.mxu0 %v4954_v4  ;;  %s6412_s9 = smul.u32 144, %s6678_s8  ;;  %s7352_s13 = sld [smem:[#allocation16_spill]] }
  0x2c   : > { %6369 = vmatprep.subr.mxu0 %v6514_v0  ;;  %s7353_s10 = sld [smem:[#allocation13_spill]]  ;;  %s7355_s5 = smul.u32 768, %s6678_s8 }
  0x2d   : > { %6370 = vmatpush3.msra.mxu0 %v4953_v5  ;;  %s7356_s0 = sld [smem:[#allocation18_spill]] }
  0x2e   : > { %6372 = vmatmul.mubr.msk.f32.vlgmr.msra.gmra.mxu0 %vm1189_vm1, %v1175_v6  ;;  %s7357_s3 = sld [smem:[#allocation17_spill]] }
  0x2f   : > { %1577 = vmatprep.mubr.f32.mxu0 %v6514_v0 }
  0x30   : > { %s1096_s22 = scalar_lea.vmem %s7351_s17, %s6684_s30 }
  0x31   : > { %v1266_v7 = vld [vmem:[%s1096_s22 + $0x8] sm:$0x3]  ;;  %v4956_v9 = vld [vmem:[%s1096_s22] sm:$0xff]   ;;  %s6774_s15 = scalar_lea.vmem %s7352_s13, %s6412_s9  ;;  %s7354_s9 = sld [smem:[#allocation15_spill]] }
  0x32   : > { %v1269_v8 = vunpack.c.l.bf16 %v1266_v7  ;;  %v4958_v10 = vunpack.c.h.bf16 %v4956_v9  ;;  %v4957_v11 = vunpack.c.l.bf16 %v4956_v9  ;;  %v1368_v12 = vld [vmem:[%s6774_s15 + $0x60] sm:$0x33]  ;;  %v1369_v13 = vld [vmem:[%s6774_s15 + $0x68] sm:$0x33]  ;;  %s1091_s7 = scalar_lea.vmem %s7353_s10, %s6678_s8  ;;  %v1362_v23 = vld [vmem:[%s6774_s15 + $0x30] sm:$0xff] }
  0x33   : > { %v1398_v14 = vunpack.c.l.bf16 %v1368_v12  ;;  %v1399_v15 = vunpack.c.h.bf16 %v1368_v12  ;;  %v1401_v16 = vunpack.c.h.bf16 %v1369_v13  ;;  %v4899_v17 = vld [vmem:[%s1091_s7] ss:$0 sm:$0xff]  ;;  %v1400_v21 = vunpack.c.l.bf16 %v1369_v13  ;;  %v1363_v24 = vld [vmem:[%s6774_s15 + $0x38] sm:$0xff]  ;;  %v1357_v30 = vld [vmem:[%s6774_s15 + $0x8] sm:$0xff]  ;;  %s6824_s10 = scalar_lea.vmem %s7356_s0, %s7355_s5  ;;  %s7359_s0 = sld [smem:[#allocation20_spill]] }
  0x34   : > { %6375 = vmatpush3.msk.msra.mxu1 %vm1281_vm2, %v1269_v8  ;;  %v1387_v25 = vunpack.c.h.bf16 %v1362_v23  ;;  %v1389_v26 = vunpack.c.h.bf16 %v1363_v24  ;;  %v1386_v27 = vunpack.c.l.bf16 %v1362_v23  ;;  %v1388_v28 = vunpack.c.l.bf16 %v1363_v24  ;;  %v1356_v29 = vld [vmem:[%s6774_s15] sm:$0xff]  ;;  %v1370_v35 = vld [vmem:[%s6774_s15 + $0x70] sm:$0x33]  ;;  %v1371_v36 = vld [vmem:[%s6774_s15 + $0x78] sm:$0x33]  ;;  %s6887_s22 = scalar_lea.vmem %s7357_s3, %s6684_s30  ;;  %s7360_s3 = sld [smem:[#allocation21_spill]] }
  0x35   : > { %6376 = vmatprep.subr.mxu1 %v6514_v0  ;;  %4904 = vmatprep.subr.msk.mxu0 %vm1281_vm2, %v1399_v15  ;;  %v1375_v31 = vunpack.c.h.bf16 %v1356_v29  ;;  %v1377_v32 = vunpack.c.h.bf16 %v1357_v30  ;;  %v1374_v33 = vunpack.c.l.bf16 %v1356_v29  ;;  %v1376_v34 = vunpack.c.l.bf16 %v1357_v30  ;;  %v1364_v41 = vld [vmem:[%s6774_s15 + $0x40] sm:$0xff]  ;;  %v1365_v42 = vld [vmem:[%s6774_s15 + $0x48] sm:$0xff]  ;;  %v1358_v47 = vld [vmem:[%s6774_s15 + $0x10] sm:$0xff] }
  0x36   : > { %6377 = vmatpush3.msra.mxu1 %v4958_v10  ;;  %4905 = vmatpush1.msk.msra.mxu0 %vm1281_vm2, %v1398_v14  ;;  %v1403_v37 = vunpack.c.h.bf16 %v1370_v35  ;;  %v1405_v38 = vunpack.c.h.bf16 %v1371_v36  ;;  %v1402_v45 = vunpack.c.l.bf16 %v1370_v35  ;;  %v1404_v46 = vunpack.c.l.bf16 %v1371_v36  ;;  %v1359_v48 = vld [vmem:[%s6774_s15 + $0x18] sm:$0xff]  ;;  %v1372_v57 = vld [vmem:[%s6774_s15 + $0x80] sm:$0x33]  ;;  %v1373_v58 = vld [vmem:[%s6774_s15 + $0x88] sm:$0x33] }
  0x37   : > { %6378 = vmatprep.subr.mxu1 %v6514_v0  ;;  %1541 = vmatprep.subr.mxu0 %v1387_v25  ;;  %s1099_s2 = scalar_lea.vmem %s7354_s9, %s6678_s8  ;;  %v1391_v50 = vunpack.c.h.bf16 %v1364_v41  ;;  %v1393_v51 = vunpack.c.h.bf16 %v1365_v42  ;;  %v1390_v52 = vunpack.c.l.bf16 %v1364_v41  ;;  %v1392_v53 = vunpack.c.l.bf16 %v1365_v42  ;;  %v1366_v60 = vld [vmem:[%s6774_s15 + $0x50] sm:$0xff]  ;;  %v1367_v61 = vld [vmem:[%s6774_s15 + $0x58] sm:$0xff]  ;;  %v1360_v3 = vld [vmem:[%s6774_s15 + $0x20] sm:$0xff] }
  0x38   : > { %6379 = vmatpush3.msra.mxu1 %v4957_v11  ;;  %1542 = vmatpush1.msra.mxu0 %v1386_v27  ;;  %v4901_v39 = vld [vmem:[%s1099_s2] ss:$0 sm:$0xff]  ;;  %v1379_v54 = vunpack.c.h.bf16 %v1358_v47  ;;  %v1381_v55 = vunpack.c.h.bf16 %v1359_v48  ;;  %v1378_v56 = vunpack.c.l.bf16 %v1358_v47  ;;  %v1380_v59 = vunpack.c.l.bf16 %v1359_v48  ;;  %v1361_v4 = vld [vmem:[%s6774_s15 + $0x28] sm:$0xff]  ;;  %v5749_v12 = vld [vmem:[%s6824_s10 + $0x78] sm:$0xff]   ;;  %s7358_s2 = sld [smem:[#allocation19_spill]] }
  0x39   : > { %4907 = vmatprep.subr.msk.mxu1 %vm1281_vm2, %v1401_v16  ;;  %1543 = vmatprep.subr.mxu0 %v1375_v31  ;;  %v1407_v62 = vunpack.c.h.bf16 %v1372_v57  ;;  %v1409_v63 = vunpack.c.h.bf16 %v1373_v58  ;;  %v1406_v1 = vunpack.c.l.bf16 %v1372_v57  ;;  %v1408_v2 = vunpack.c.l.bf16 %v1373_v58  ;;  %v5765_v13 = vld [vmem:[%s6824_s10 + $0xf8] sm:$0xff]   ;;  %v5740_v25 = vld [vmem:[%s6824_s10 + $0x30] sm:$0xff]  }
  0x3a   : > { %1544 = vmatpush1.msra.mxu0 %v1374_v33  ;;  %v1395_v5 = vunpack.c.h.bf16 %v1366_v60  ;;  %v1397_v6 = vunpack.c.h.bf16 %v1367_v61  ;;  %v1394_v7 = vunpack.c.l.bf16 %v1366_v60  ;;  %v1396_v8 = vunpack.c.l.bf16 %v1367_v61  ;;  %v5741_v15 = vld [vmem:[%s6824_s10 + $0x38] sm:$0xff]   ;;  %v5747_v33 = vld [vmem:[%s6824_s10 + $0x68] sm:$0xff]  }
  0x3b   : > { %4910 = vmatprep.subr.msk.mxu0 %vm1281_vm2, %v1403_v37  ;;  %v1383_v9 = vunpack.c.h.bf16 %v1360_v3  ;;  %v1385_v10 = vunpack.c.h.bf16 %v1361_v4  ;;  %v1382_v11 = vunpack.c.l.bf16 %v1360_v3  ;;  %v1384_v14 = vunpack.c.l.bf16 %v1361_v4  ;;  %v5757_v16 = vld [vmem:[%s6824_s10 + $0xb8] sm:$0xff]   ;;  %v5739_v37 = vld [vmem:[%s6824_s10 + $0x28] sm:$0xff]  }
  0x3c   : > { %v5021_v23 = vunpack.c.l.bf16 %v5749_v12  ;;  %v5085_v24 = vunpack.c.l.bf16 %v5765_v13  ;;  %v4989_v27 = vunpack.c.l.bf16 %v5741_v15  ;;  %v4986_v31 = vunpack.c.h.bf16 %v5740_v25  ;;  %v5745_v57 = vld [vmem:[%s6824_s10 + $0x58] sm:$0xff]  }
  0x3d   : > { %v5014_v41 = vunpack.c.h.bf16 %v5747_v33  ;;  %v5013_v47 = vunpack.c.l.bf16 %v5747_v33  ;;  %v5761_v58 = vld [vmem:[%s6824_s10 + $0xd8] sm:$0xff]  }
  0x3e   : > { %v5737_v61 = vld [vmem:[%s6824_s10 + $0x18] sm:$0xff]   ;;  %v5070_v3 = vunpack.c.h.bf16 %v5761_v58  ;;  %s1116_s5 = scalar_lea.vmem %s7358_s2, %s6678_s8  ;;  %s1170_s2 = scalar_lea.vmem %s7317_s24, %s6746_s23 }
  0x3f   : > { %v4974_v4 = vunpack.c.h.bf16 %v5737_v61 }
  0xee   : > { %v1259_v18 = vpop.f32.mrf.mxu0 }
  0xef   : > { %v1260_v19 = vadd.f32 %v4899_v17, %v1259_v18  ;;  %v5022_v17 = vunpack.c.h.bf16 %v5749_v12  ;;  %v5086_v18 = vunpack.c.h.bf16 %v5765_v13  ;;  %v4973_v12 = vunpack.c.l.bf16 %v5737_v61 }
  0xf0   : > { %v6373_v20 = vpop.f32.mrf.mxu0 }
  0xf1   : > { %v1263_v22 = vmax.f32 %v1260_v19, 0.0  ;;  %v4990_v19 = vunpack.c.h.bf16 %v5741_v15  ;;  %v5054_v20 = vunpack.c.h.bf16 %v5757_v16 }
  0xf3   : > { %6381 = vmatmul.mubr.msk.f32.vlgmr.msra.gmra.mxu1 %vm1277_vm3, %v1263_v22  ;;  %v5764_v22 = vld [vmem:[%s6824_s10 + $0xf0] sm:$0xff]  }
  0xf4   : > { %4908 = vmatpush1.msk.msra.mxu1 %vm1281_vm2, %v1400_v21  ;;  %1648 = vmatprep.mubr.f32.mxu1 %v6514_v0  ;;  %v5748_v21 = vld [vmem:[%s6824_s10 + $0x70] sm:$0xff]   ;;  %v5082_v30 = vunpack.c.h.bf16 %v5764_v22  ;;  %v5081_v36 = vunpack.c.l.bf16 %v5764_v22 }
  0xf5   : > { %1612 = vmatprep.subr.mxu1 %v1389_v26  ;;  %v5756_v26 = vld [vmem:[%s6824_s10 + $0xb0] sm:$0xff]   ;;  %v5018_v29 = vunpack.c.h.bf16 %v5748_v21  ;;  %v5017_v35 = vunpack.c.l.bf16 %v5748_v21 }
  0xf6   : > { %1613 = vmatpush1.msra.mxu1 %v1388_v28  ;;  %v5053_v28 = vunpack.c.l.bf16 %v5757_v16 }
  0xf7   : > { %1614 = vmatprep.subr.mxu1 %v1377_v32  ;;  %v5050_v32 = vunpack.c.h.bf16 %v5756_v26 }
  0xf8   : > { %1615 = vmatpush1.msra.mxu1 %v1376_v34  ;;  %v5763_v34 = vld [vmem:[%s6824_s10 + $0xe8] sm:$0xff]  }
  0xf9   : > { %4913 = vmatprep.subr.msk.mxu1 %vm1281_vm2, %v1405_v38  ;;  %v5755_v38 = vld [vmem:[%s6824_s10 + $0xa8] sm:$0xff]   ;;  %v5078_v42 = vunpack.c.h.bf16 %v5763_v34  ;;  %v5077_v48 = vunpack.c.l.bf16 %v5763_v34  ;;  %v5742_v34 = vld [vmem:[%s6824_s10 + $0x40] sm:$0xff]  }
 0x1b3   : > { %v1351_v40 = vpop.f32.mrf.mxu1 }
 0x1b4   : > { %v1352_v43 = vadd.f32 %v4901_v39, %v1351_v40  ;;  %v4985_v39 = vunpack.c.l.bf16 %v5740_v25  ;;  %v5049_v40 = vunpack.c.l.bf16 %v5756_v26  ;;  %v5735_v26 = vld [vmem:[%s6824_s10 + $0x8] sm:$0xff]  }
 0x1b5   : > { %v6382_v44 = vpop.f32.mrf.mxu1 }
 0x1b6   : > { %v6804_v49 = vmax.f32 %v1352_v43, 0.0  ;;  %v4982_v43 = vunpack.c.h.bf16 %v5739_v37  ;;  %v5046_v44 = vunpack.c.h.bf16 %v5755_v38 }
 0x1b8   : > { %4906 = vmatmul.mubr.msk.f32.vlgmr.msra.gmra.mxu0 %vm1277_vm3, %v6804_v49  ;;  %4909 = vmatmul.mubr.msk.f32.vlgmr.msra.gmra.mxu1 %vm1277_vm3, %v6804_v49 }
 0x1b9   : > { %4911 = vmatpush1.msk.msra.mxu0 %vm1281_vm2, %v1402_v45  ;;  %4914 = vmatpush1.msk.msra.mxu1 %vm1281_vm2, %v1404_v46  ;;  %v5746_v45 = vld [vmem:[%s6824_s10 + $0x60] sm:$0xff]  }
 0x1ba   : > { %1683 = vmatprep.subr.mxu0 %v1391_v50  ;;  %1754 = vmatprep.subr.mxu1 %v1393_v51  ;;  %v5762_v46 = vld [vmem:[%s6824_s10 + $0xe0] sm:$0xff]   ;;  %v4981_v51 = vunpack.c.l.bf16 %v5739_v37 }
 0x1bb   : > { %1684 = vmatpush1.msra.mxu0 %v1390_v52  ;;  %1755 = vmatpush1.msra.mxu1 %v1392_v53  ;;  %v5754_v50 = vld [vmem:[%s6824_s10 + $0xa0] sm:$0xff]   ;;  %v5045_v52 = vunpack.c.l.bf16 %v5755_v38  ;;  %v5010_v53 = vunpack.c.h.bf16 %v5746_v45  ;;  %v5073_v60 = vunpack.c.l.bf16 %v5762_v46 }
 0x1bc   : > { %1685 = vmatprep.subr.mxu0 %v1379_v54  ;;  %1756 = vmatprep.subr.mxu1 %v1381_v55  ;;  %v5074_v54 = vunpack.c.h.bf16 %v5762_v46  ;;  %v4960_v38 = vld [vmem:[%s6824_s10] sm:$0xff]   ;;  %v6874_v46 = vld [vmem:[%s6824_s10 + $0x178] sm:$0xff]  }
 0x1bd   : > { %1686 = vmatpush1.msra.mxu0 %v1378_v56  ;;  %1719 = vmatprep.mubr.f32.mxu0 %v6514_v0  ;;  %v5042_v56 = vunpack.c.h.bf16 %v5754_v50 }
 0x1be   : > { %1757 = vmatpush1.msra.mxu1 %v1380_v59  ;;  %1790 = vmatprep.mubr.f32.mxu1 %v6514_v0  ;;  %v5009_v59 = vunpack.c.l.bf16 %v5746_v45 }
 0x1bf   : > { %4912 = vmatmul.mubr.msk.f32.vlgmr.msra.gmra.mxu0 %vm1277_vm3, %v6804_v49  ;;  %4915 = vmatmul.mubr.msk.f32.vlgmr.msra.gmra.mxu1 %vm1277_vm3, %v6804_v49 }
 0x1c0   : > { %4916 = vmatprep.subr.msk.mxu0 %vm1281_vm2, %v1407_v62  ;;  %4919 = vmatprep.subr.msk.mxu1 %vm1281_vm2, %v1409_v63  ;;  %v5753_v62 = vld [vmem:[%s6824_s10 + $0x98] sm:$0xff]  }
 0x1c1   : > { %4917 = vmatpush1.msk.msra.mxu0 %vm1281_vm2, %v1406_v1  ;;  %4920 = vmatpush1.msk.msra.mxu1 %vm1281_vm2, %v1408_v2  ;;  %v5041_v1 = vunpack.c.l.bf16 %v5754_v50  ;;  %v5006_v2 = vunpack.c.h.bf16 %v5745_v57  ;;  %v5037_v13 = vunpack.c.l.bf16 %v5753_v62  ;;  %v1414_v50 = vlaneseq }
 0x1c2   : > { %1825 = vmatprep.subr.mxu0 %v1395_v5  ;;  %1896 = vmatprep.subr.mxu1 %v1397_v6  ;;  %v5038_v5 = vunpack.c.h.bf16 %v5753_v62  ;;  %v5744_v6 = vld [vmem:[%s6824_s10 + $0x50] sm:$0xff]  }
 0x1c3   : > { %1826 = vmatpush1.msra.mxu0 %v1394_v7  ;;  %1897 = vmatpush1.msra.mxu1 %v1396_v8  ;;  %v5760_v7 = vld [vmem:[%s6824_s10 + $0xd0] sm:$0xff]   ;;  %v5005_v8 = vunpack.c.l.bf16 %v5745_v57 }
 0x1c4   : > { %1827 = vmatprep.subr.mxu0 %v1383_v9  ;;  %1898 = vmatprep.subr.mxu1 %v1385_v10  ;;  %v5069_v9 = vunpack.c.l.bf16 %v5761_v58  ;;  %v5736_v10 = vld [vmem:[%s6824_s10 + $0x10] sm:$0xff]   ;;  %v5066_v15 = vunpack.c.h.bf16 %v5760_v7  ;;  %v5065_v21 = vunpack.c.l.bf16 %v5760_v7  ;;  %v5789_v7 = vld [vmem:[%s6824_s10 + $0x1b8] sm:$0xff]  }
 0x1c5   : > { %1828 = vmatpush1.msra.mxu0 %v1382_v11  ;;  %1861 = vmatprep.mubr.f32.mxu0 %v6514_v0  ;;  %v5752_v11 = vld [vmem:[%s6824_s10 + $0x90] sm:$0xff]   ;;  %v4970_v16 = vunpack.c.h.bf16 %v5736_v10  ;;  %v4969_v22 = vunpack.c.l.bf16 %v5736_v10 }
 0x1c6   : > { %1899 = vmatpush1.msra.mxu1 %v1384_v14  ;;  %1932 = vmatprep.mubr.f32.mxu1 %v6514_v0  ;;  %v5002_v14 = vunpack.c.h.bf16 %v5744_v6 }
 0x1c7   : > { %4918 = vmatmul.mubr.msk.f32.vlgmr.msra.gmra.mxu0 %vm1277_vm3, %v6804_v49  ;;  %4921 = vmatmul.mubr.msk.f32.vlgmr.msra.gmra.mxu1 %vm1277_vm3, %v6804_v49  ;;  %v5738_v49 = vld [vmem:[%s6824_s10 + $0x20] sm:$0xff]  }
 0x1c8   : > { %5933 = vmatprep.subr.mxu0 %v5022_v17  ;;  %5968 = vmatprep.subr.mxu1 %v5086_v18  ;;  %v4978_v55 = vunpack.c.h.bf16 %v5738_v49  ;;  %v4977_v63 = vunpack.c.l.bf16 %v5738_v49  ;;  %v5034_v17 = vunpack.c.h.bf16 %v5752_v11  ;;  %v5743_v18 = vld [vmem:[%s6824_s10 + $0x48] sm:$0xff]  }
 0x1c9   : > { %5934 = vmatpush3.msra.mxu0 %v4990_v19  ;;  %5969 = vmatpush3.msra.mxu1 %v5054_v20  ;;  %v5759_v19 = vld [vmem:[%s6824_s10 + $0xc8] sm:$0xff]   ;;  %v5001_v20 = vunpack.c.l.bf16 %v5744_v6 }
 0x1ca   : > { %5935 = vmatprep.subr.mxu0 %v5021_v23  ;;  %5970 = vmatprep.subr.mxu1 %v5085_v24  ;;  %v5033_v23 = vunpack.c.l.bf16 %v5752_v11  ;;  %v4998_v24 = vunpack.c.h.bf16 %v5743_v18  ;;  %v5062_v25 = vunpack.c.h.bf16 %v5759_v19 }
 0x1cb   : > { %5936 = vmatpush3.msra.mxu0 %v4989_v27  ;;  %5971 = vmatpush3.msra.mxu1 %v5053_v28  ;;  %v5751_v27 = vld [vmem:[%s6824_s10 + $0x88] sm:$0xff]   ;;  %v4966_v28 = vunpack.c.h.bf16 %v5735_v26 }
 0x1cc   : > { %5937 = vmatprep.subr.mxu0 %v5018_v29  ;;  %5972 = vmatprep.subr.mxu1 %v5082_v30  ;;  %v5030_v29 = vunpack.c.h.bf16 %v5751_v27  ;;  %v4997_v30 = vunpack.c.l.bf16 %v5743_v18  ;;  %v5029_v33 = vunpack.c.l.bf16 %v5751_v27  ;;  %v5181_v27 = vunpack.c.l.bf16 %v5789_v7 }
 0x1cd   : > { %5938 = vmatpush3.msra.mxu0 %v4986_v31  ;;  %5973 = vmatpush3.msra.mxu1 %v5050_v32  ;;  %v5061_v31 = vunpack.c.l.bf16 %v5759_v19  ;;  %v4965_v32 = vunpack.c.l.bf16 %v5735_v26 }
 0x1ce   : > { %5939 = vmatprep.subr.mxu0 %v5017_v35  ;;  %5974 = vmatprep.subr.mxu1 %v5081_v36  ;;  %v5758_v35 = vld [vmem:[%s6824_s10 + $0xc0] sm:$0xff]   ;;  %v4994_v36 = vunpack.c.h.bf16 %v5742_v34 }
 0x1cf   : > { %5940 = vmatpush3.msra.mxu0 %v4985_v39  ;;  %5975 = vmatpush3.msra.mxu1 %v5049_v40  ;;  %v5058_v37 = vunpack.c.h.bf16 %v5758_v35  ;;  %v5750_v39 = vld [vmem:[%s6824_s10 + $0x80] sm:$0xff]   ;;  %v4962_v40 = vunpack.c.h.bf16 %v4960_v38 }
 0x1d0   : > { %5941 = vmatprep.subr.mxu0 %v5014_v41  ;;  %5976 = vmatprep.subr.mxu1 %v5078_v42  ;;  %v5026_v41 = vunpack.c.h.bf16 %v5750_v39  ;;  %v4993_v42 = vunpack.c.l.bf16 %v5742_v34  ;;  %v5025_v45 = vunpack.c.l.bf16 %v5750_v39 }
 0x1d1   : > { %5942 = vmatpush3.msra.mxu0 %v4982_v43  ;;  %5977 = vmatpush3.msra.mxu1 %v5046_v44  ;;  %v5057_v43 = vunpack.c.l.bf16 %v5758_v35  ;;  %v4961_v44 = vunpack.c.l.bf16 %v4960_v38 }
 0x1d2   : > { %5943 = vmatprep.subr.mxu0 %v5013_v47  ;;  %5978 = vmatprep.subr.mxu1 %v5077_v48  ;;  %v6877_v47 = vld [vmem:[%s6824_s10 + $0x1f8] sm:$0xff]   ;;  %v5150_v48 = vunpack.c.h.bf16 %v6874_v46 }
 0x1d3   : > { %5944 = vmatpush3.msra.mxu0 %v4981_v51  ;;  %5979 = vmatpush3.msra.mxu1 %v5045_v52  ;;  %v5214_v49 = vunpack.c.h.bf16 %v6877_v47  ;;  %v6881_v51 = vshrl.u32 %v1414_v50, 7  ;;  %v5778_v50 = vld [vmem:[%s6824_s10 + $0x160] sm:$0xff]  }
 0x1d4   : > { %5945 = vmatprep.subr.mxu0 %v5010_v53  ;;  %5980 = vmatprep.subr.mxu1 %v5074_v54  ;;  %v6896_v54 = vld [vmem:[%s6887_s22] sm:$0xff] }
 0x1d5   : > { %5946 = vmatpush3.msra.mxu0 %v4978_v55  ;;  %5981 = vmatpush3.msra.mxu1 %v5042_v56  ;;  %v6890_v52 = vsub.s32 0, %v6881_v51  ;;  %v6893_v53 = vsub.s32 2, %v6881_v51  ;;  %v6899_v55 = vsub.s32 1, %v6881_v51  ;;  %v6902_v56 = vsub.s32 3, %v6881_v51 }
 0x1d6   : > { %5947 = vmatprep.subr.mxu0 %v5009_v59  ;;  %5982 = vmatprep.subr.mxu1 %v5073_v60  ;;  %vm2764_vm4 = vcmp.lt.s32.totalorder %v6881_v51, 6 }
 0x1d7   : > { %5948 = vmatpush3.msra.mxu0 %v4977_v63  ;;  %5983 = vmatpush3.msra.mxu1 %v5041_v1  ;;  %v1417_v57 = vrot.slane %v6896_v54, %v6890_v52  ;;  %v1425_v58 = vrot.slane %v6896_v54, %v6893_v53  ;;  %v1421_v59 = vrot.slane %v6896_v54, %v6899_v55  ;;  %v1436_v63 = vsub.s32 5, %v6881_v51 }
 0x1d8   : > { %5949 = vmatprep.subr.mxu0 %v5006_v2  ;;  %5984 = vmatprep.subr.mxu1 %v5070_v3  ;;  %v1429_v60 = vrot.slane %v6896_v54, %v6902_v56  ;;  %v1444_v1 = vsub.s32 7, %v6881_v51  ;;  %v5773_v2 = vld [vmem:[%s6824_s10 + $0x138] sm:$0xff]  }
 0x1d9   : > { %5950 = vmatpush3.msra.mxu0 %v4974_v4  ;;  %5985 = vmatpush3.msra.mxu1 %v5038_v5  ;;  %v1437_v10 = vrot.slane %v6896_v54, %v1436_v63  ;;  %v5118_v11 = vunpack.c.h.bf16 %v5773_v2  ;;  %v5117_v26 = vunpack.c.l.bf16 %v5773_v2 }
 0x1da   : > { %5951 = vmatprep.subr.mxu0 %v5005_v8  ;;  %5986 = vmatprep.subr.mxu1 %v5069_v9 }
 0x1db   : > { %5952 = vmatpush3.msra.mxu0 %v4973_v12  ;;  %5987 = vmatpush3.msra.mxu1 %v5037_v13 }
 0x1dc   : > { %5953 = vmatprep.subr.mxu0 %v5002_v14  ;;  %5988 = vmatprep.subr.mxu1 %v5066_v15  ;;  %v1445_v14 = vrot.slane %v6896_v54, %v1444_v1  ;;  %v5182_v15 = vunpack.c.h.bf16 %v5789_v7  ;;  %v5777_v7 = vld [vmem:[%s6824_s10 + $0x158] sm:$0xff]  }
 0x1dd   : > { %5954 = vmatpush3.msra.mxu0 %v4970_v16  ;;  %5989 = vmatpush3.msra.mxu1 %v5034_v17  ;;  %v5780_v16 = vld [vmem:[%s6824_s10 + $0x170] sm:$0xff]  }
 0x1de   : > { %5955 = vmatprep.subr.mxu0 %v5001_v20  ;;  %5990 = vmatprep.subr.mxu1 %v5065_v21  ;;  %v5796_v17 = vld [vmem:[%s6824_s10 + $0x1f0] sm:$0xff]   ;;  %v5149_v20 = vunpack.c.l.bf16 %v6874_v46  ;;  %v5213_v21 = vunpack.c.l.bf16 %v6877_v47  ;;  %v5145_v38 = vunpack.c.l.bf16 %v5780_v16 }
 0x1df   : > { %5956 = vmatpush3.msra.mxu0 %v4969_v22  ;;  %5991 = vmatpush3.msra.mxu1 %v5033_v23  ;;  %v5772_v22 = vld [vmem:[%s6824_s10 + $0x130] sm:$0xff]   ;;  %v5209_v39 = vunpack.c.l.bf16 %v5796_v17 }
 0x1e0   : > { %5957 = vmatprep.subr.mxu0 %v4998_v24  ;;  %5992 = vmatprep.subr.mxu1 %v5062_v25  ;;  %v5788_v23 = vld [vmem:[%s6824_s10 + $0x1b0] sm:$0xff]  }
 0x1e1   : > { %5958 = vmatpush3.msra.mxu0 %v4966_v28  ;;  %5993 = vmatpush3.msra.mxu1 %v5030_v29  ;;  %v5146_v28 = vunpack.c.h.bf16 %v5780_v16  ;;  %v5210_v29 = vunpack.c.h.bf16 %v5796_v17 }
 0x1e2   : > { %5959 = vmatprep.subr.mxu0 %v4997_v30  ;;  %5994 = vmatprep.subr.mxu1 %v5061_v31 }
 0x1e3   : > { %5960 = vmatpush3.msra.mxu0 %v4965_v32  ;;  %5995 = vmatpush3.msra.mxu1 %v5029_v33  ;;  %v5114_v32 = vunpack.c.h.bf16 %v5772_v22  ;;  %v5178_v33 = vunpack.c.h.bf16 %v5788_v23 }
 0x1e4   : > { %5961 = vmatprep.subr.mxu0 %v4994_v36  ;;  %5996 = vmatprep.subr.mxu1 %v5058_v37  ;;  %v5779_v36 = vld [vmem:[%s6824_s10 + $0x168] sm:$0xff]  }
 0x1e5   : > { %5962 = vmatpush3.msra.mxu0 %v4962_v40  ;;  %5997 = vmatpush3.msra.mxu1 %v5026_v41  ;;  %v5795_v37 = vld [vmem:[%s6824_s10 + $0x1e8] sm:$0xff]   ;;  %v5142_v46 = vunpack.c.h.bf16 %v5779_v36 }
 0x1e6   : > { %5963 = vmatprep.subr.mxu0 %v4993_v42  ;;  %5998 = vmatprep.subr.mxu1 %v5057_v43  ;;  %v5771_v40 = vld [vmem:[%s6824_s10 + $0x128] sm:$0xff]   ;;  %v5206_v47 = vunpack.c.h.bf16 %v5795_v37 }
 0x1e7   : > { %5964 = vmatpush3.msra.mxu0 %v4961_v44  ;;  %5999 = vmatpush3.msra.mxu1 %v5025_v45  ;;  %v5787_v41 = vld [vmem:[%s6824_s10 + $0x1a8] sm:$0xff]   ;;  %v5113_v44 = vunpack.c.l.bf16 %v5772_v22  ;;  %v5177_v45 = vunpack.c.l.bf16 %v5788_v23  ;;  %v5768_v23 = vld [vmem:[%s6824_s10 + $0x110] sm:$0xff]  }
 0x1e8   : > { %6003 = vmatprep.subr.mxu0 %v5150_v48  ;;  %6038 = vmatprep.subr.mxu1 %v5214_v49  ;;  %v5110_v48 = vunpack.c.h.bf16 %v5771_v40  ;;  %v5174_v49 = vunpack.c.h.bf16 %v5787_v41  ;;  %v5173_v2 = vunpack.c.l.bf16 %v5787_v41  ;;  %v5097_v41 = vunpack.c.l.bf16 %v5768_v23 }
 0x278   : > { %v1579_v61 = vpop.f32.mrf.mxu0  ;;  %v1650_v62 = vpop.f32.mrf.mxu1 }
 0x279   : > { %v1580_v3 = vadd.f32 %v1579_v61, %v1417_v57  ;;  %v1651_v4 = vadd.f32 %v1650_v62, %v1425_v58  ;;  %v5794_v57 = vld [vmem:[%s6824_s10 + $0x1e0] sm:$0xff]   ;;  %v5141_v58 = vunpack.c.l.bf16 %v5779_v36  ;;  %v5109_v62 = vunpack.c.l.bf16 %v5771_v40  ;;  %v5783_v40 = vld [vmem:[%s6824_s10 + $0x188] sm:$0xff]  }
 0x27a   : > { %v1581_v5 = vpop.f32.mrf.mxu0  ;;  %v1652_v6 = vpop.f32.mrf.mxu1  ;;  %v5786_v61 = vld [vmem:[%s6824_s10 + $0x1a0] sm:$0xff]   ;;  %v1440_v36 = vsub.s32 6, %v6881_v51 }
 0x27b   : > { %v1582_v8 = vadd.f32 %v1581_v5, %v1421_v59  ;;  %v1653_v9 = vadd.f32 %v1652_v6, %v1429_v60  ;;  %v1939_v18 = vmax.f32 %v1580_v3, 0.0  ;;  %v1941_v19 = vmax.f32 %v1651_v4, 0.0  ;;  %v5770_v60 = vld [vmem:[%s6824_s10 + $0x120] sm:$0xff]  }
 0x27c   : > { %v5205_v59 = vunpack.c.l.bf16 %v5795_v37  ;;  %v5138_v3 = vunpack.c.h.bf16 %v5778_v50  ;;  %v5202_v4 = vunpack.c.h.bf16 %v5794_v57  ;;  %v5106_v5 = vunpack.c.h.bf16 %v5770_v60 }
 0x27d   : > { %v1940_v12 = vmax.f32 %v1582_v8, 0.0  ;;  %v1942_v13 = vmax.f32 %v1653_v9, 0.0  ;;  %v5170_v6 = vunpack.c.h.bf16 %v5786_v61  ;;  %v5793_v8 = vld [vmem:[%s6824_s10 + $0x1d8] sm:$0xff]   ;;  %v5137_v9 = vunpack.c.l.bf16 %v5778_v50 }
 0x27e   : > { %v5198_v16 = vunpack.c.h.bf16 %v5793_v8  ;;  %v5197_v22 = vunpack.c.l.bf16 %v5793_v8 }
 0x27f   : > { %v6928_v24 = vpop.f32.mrf.mxu0  ;;  %v6930_v25 = vpop.f32.mrf.mxu1  ;;  %2406 = vmatprep.mubr.f32.mxu0 %v1940_v12  ;;  %2476 = vmatprep.mubr.f32.mxu1 %v1942_v13  ;;  %v5785_v12 = vld [vmem:[%s6824_s10 + $0x198] sm:$0xff]   ;;  %v5105_v13 = vunpack.c.l.bf16 %v5770_v60 }
 0x280   : > { %2407 = vmatmul.mubr.f32.vlgmr.msra.gmra.mxu0 %v1939_v18  ;;  %2477 = vmatmul.mubr.f32.vlgmr.msra.gmra.mxu1 %v1941_v19  ;;  %v5166_v18 = vunpack.c.h.bf16 %v5785_v12  ;;  %v5776_v19 = vld [vmem:[%s6824_s10 + $0x150] sm:$0xff]  }
 0x281   : > { %v1723_v30 = vpop.f32.mrf.mxu0  ;;  %v1794_v31 = vpop.f32.mrf.mxu1  ;;  %6004 = vmatpush3.msra.mxu0 %v5118_v11  ;;  %6039 = vmatpush3.msra.mxu1 %v5182_v15  ;;  %v5769_v11 = vld [vmem:[%s6824_s10 + $0x118] sm:$0xff]   ;;  %v5134_v15 = vunpack.c.h.bf16 %v5777_v7  ;;  %v5129_v37 = vunpack.c.l.bf16 %v5776_v19 }
 0x282   : > { %v1724_v34 = vadd.f32 %v1723_v30, %v1437_v10  ;;  %v1795_v35 = vadd.f32 %v1794_v31, %v1445_v14  ;;  %6005 = vmatprep.subr.mxu0 %v5149_v20  ;;  %6040 = vmatprep.subr.mxu1 %v5213_v21  ;;  %v5201_v10 = vunpack.c.l.bf16 %v5794_v57  ;;  %v5169_v14 = vunpack.c.l.bf16 %v5786_v61  ;;  %v5792_v20 = vld [vmem:[%s6824_s10 + $0x1d0] sm:$0xff]   ;;  %v5766_v61 = vld [vmem:[%s6824_s10 + $0x100] sm:$0xff]  }
 0x283   : > { %6006 = vmatpush3.msra.mxu0 %v5117_v26  ;;  %6041 = vmatpush3.msra.mxu1 %v5181_v27  ;;  %v5102_v17 = vunpack.c.h.bf16 %v5769_v11  ;;  %v5133_v21 = vunpack.c.l.bf16 %v5777_v7  ;;  %v5784_v26 = vld [vmem:[%s6824_s10 + $0x190] sm:$0xff]   ;;  %v5101_v27 = vunpack.c.l.bf16 %v5769_v11  ;;  %v5194_v30 = vunpack.c.h.bf16 %v5792_v20 }
 0x284   : > { %v1944_v42 = vmax.f32 %v1724_v34, 0.0  ;;  %v1946_v43 = vmax.f32 %v1795_v35, 0.0  ;;  %6007 = vmatprep.subr.mxu0 %v5146_v28  ;;  %6042 = vmatprep.subr.mxu1 %v5210_v29  ;;  %v5165_v28 = vunpack.c.l.bf16 %v5785_v12  ;;  %v5130_v29 = vunpack.c.h.bf16 %v5776_v19  ;;  %v5791_v34 = vld [vmem:[%s6824_s10 + $0x1c8] sm:$0xff]  }
 0x285   : > { %6008 = vmatpush3.msra.mxu0 %v5114_v32  ;;  %6043 = vmatpush3.msra.mxu1 %v5178_v33  ;;  %v5098_v31 = vunpack.c.h.bf16 %v5768_v23  ;;  %v5162_v32 = vunpack.c.h.bf16 %v5784_v26  ;;  %v5775_v33 = vld [vmem:[%s6824_s10 + $0x148] sm:$0xff]   ;;  %v1432_v35 = vsub.s32 4, %v6881_v51  ;;  %v1441_v57 = vrot.slane %v6896_v54, %v1440_v36 }
 0x286   : > { %2546 = vmatprep.mubr.f32.mxu0 %v1944_v42  ;;  %2616 = vmatprep.mubr.f32.mxu1 %v1946_v43  ;;  %v5161_v42 = vunpack.c.l.bf16 %v5784_v26  ;;  %v5126_v43 = vunpack.c.h.bf16 %v5775_v33  ;;  %v5189_v60 = vunpack.c.l.bf16 %v5791_v34 }
 0x287   : > { %6009 = vmatprep.subr.mxu0 %v5145_v38  ;;  %6044 = vmatprep.subr.mxu1 %v5209_v39  ;;  %v5193_v38 = vunpack.c.l.bf16 %v5792_v20  ;;  %v5767_v39 = vld [vmem:[%s6824_s10 + $0x108] sm:$0xff]   ;;  %v1433_v50 = vrot.slane %v6896_v54, %v1432_v35  ;;  %v1793_v12 = vadd.f32 %v6930_v25, %v1441_v57  ;;  %v5805_v20 = vld [vmem:[%s6824_s10 + $0x238] sm:$0xff]  }
 0x288   : > { %6010 = vmatpush3.msra.mxu0 %v5113_v44  ;;  %6045 = vmatpush3.msra.mxu1 %v5177_v45  ;;  %v5190_v44 = vunpack.c.h.bf16 %v5791_v34  ;;  %v6954_v45 = vpop.f32.mrf.mxu0  ;;  %v5803_v57 = vld [vmem:[%s6824_s10 + $0x228] sm:$0xff]  }
 0x289   : > { %6011 = vmatprep.subr.mxu0 %v5142_v46  ;;  %6046 = vmatprep.subr.mxu1 %v5206_v47  ;;  %v5094_v46 = vunpack.c.h.bf16 %v5767_v39  ;;  %v5158_v47 = vunpack.c.h.bf16 %v5783_v40  ;;  %v1722_v11 = vadd.f32 %v6928_v24, %v1433_v50  ;;  %v5821_v24 = vld [vmem:[%s6824_s10 + $0x2b8] sm:$0xff]  }
 0x28a   : > { %6012 = vmatpush3.msra.mxu0 %v5110_v48  ;;  %6047 = vmatpush3.msra.mxu1 %v5174_v49  ;;  %v5774_v48 = vld [vmem:[%s6824_s10 + $0x140] sm:$0xff]   ;;  %v1865_v7 = vpop.f32.mrf.mxu0 }
 0x28b   : > { %6013 = vmatprep.subr.mxu0 %v5141_v58  ;;  %6048 = vmatprep.subr.mxu1 %v5205_v59  ;;  %v5790_v49 = vld [vmem:[%s6824_s10 + $0x1c0] sm:$0xff]   ;;  %v6964_v58 = vpop.f32.mrf.mxu1  ;;  %v5125_v59 = vunpack.c.l.bf16 %v5775_v33  ;;  %v5122_v54 = vunpack.c.h.bf16 %v5774_v48  ;;  %v1943_v26 = vmax.f32 %v1722_v11, 0.0  ;;  %v5237_v11 = vunpack.c.l.bf16 %v5803_v57 }
 0x28c   : > { %6014 = vmatpush3.msra.mxu0 %v5109_v62  ;;  %6049 = vmatpush3.msra.mxu1 %v5173_v2  ;;  %v5782_v62 = vld [vmem:[%s6824_s10 + $0x180] sm:$0xff]   ;;  %v6969_v2 = vld [vmem:[%s6887_s22 + $0x8] sm:$0xf]  ;;  %s1122_s22 = scalar_lea.vmem %s7360_s3, %s6678_s8 }
 0x28d   : > { %6015 = vmatprep.subr.mxu0 %v5138_v3  ;;  %6050 = vmatprep.subr.mxu1 %v5202_v4  ;;  %v5093_v3 = vunpack.c.l.bf16 %v5767_v39  ;;  %v5157_v4 = vunpack.c.l.bf16 %v5783_v40  ;;  %v1461_v8 = vrot.slane %v6969_v2, %v6902_v56  ;;  %v5153_v19 = vunpack.c.l.bf16 %v5782_v62 }
 0x28e   : > { %6016 = vmatpush3.msra.mxu0 %v5106_v5  ;;  %6051 = vmatpush3.msra.mxu1 %v5170_v6  ;;  %v1453_v5 = vrot.slane %v6969_v2, %v6899_v55  ;;  %v5186_v6 = vunpack.c.h.bf16 %v5790_v49  ;;  %v5245_v40 = vunpack.c.l.bf16 %v5805_v20 }
 0x28f   : > { %6017 = vmatprep.subr.mxu0 %v5137_v9  ;;  %6052 = vmatprep.subr.mxu1 %v5201_v10  ;;  %v5090_v9 = vunpack.c.h.bf16 %v5766_v61  ;;  %v5154_v10 = vunpack.c.h.bf16 %v5782_v62 }
 0x290   : > { %6018 = vmatpush3.msra.mxu0 %v5105_v13  ;;  %6053 = vmatpush3.msra.mxu1 %v5169_v14  ;;  %v1936_v13 = vpop.f32.mrf.mxu1  ;;  %v5121_v14 = vunpack.c.l.bf16 %v5774_v48  ;;  %v5827_v48 = vld [vmem:[%s6824_s10 + $0x2e8] sm:$0xff]  }
 0x291   : > { %6019 = vmatprep.subr.mxu0 %v5134_v15  ;;  %6054 = vmatprep.subr.mxu1 %v5198_v16  ;;  %v5185_v15 = vunpack.c.l.bf16 %v5790_v49  ;;  %v5813_v16 = vld [vmem:[%s6824_s10 + $0x278] sm:$0xff]   ;;  %v1937_v25 = vadd.f32 %v1936_v13, %v1461_v8  ;;  %v5333_v8 = vunpack.c.l.bf16 %v5827_v48 }
 0x292   : > { %6020 = vmatpush3.msra.mxu0 %v5102_v17  ;;  %6055 = vmatpush3.msra.mxu1 %v5166_v18  ;;  %v5829_v17 = vld [vmem:[%s6824_s10 + $0x2f8] sm:$0xff]   ;;  %v5089_v18 = vunpack.c.l.bf16 %v5766_v61  ;;  %v5277_v33 = vunpack.c.l.bf16 %v5813_v16 }
 0x293   : > { %6021 = vmatprep.subr.mxu0 %v5133_v21  ;;  %6056 = vmatprep.subr.mxu1 %v5197_v22  ;;  %v1866_v21 = vadd.f32 %v1865_v7, %v1453_v5  ;;  %v5278_v22 = vunpack.c.h.bf16 %v5813_v16  ;;  %v5342_v23 = vunpack.c.h.bf16 %v5829_v17  ;;  %v5341_v34 = vunpack.c.l.bf16 %v5829_v17  ;;  %v5809_v17 = vld [vmem:[%s6824_s10 + $0x258] sm:$0xff]  }
 0x294   : > { %6022 = vmatpush3.msra.mxu0 %v5101_v27  ;;  %6057 = vmatpush3.msra.mxu1 %v5165_v28  ;;  %v1945_v27 = vmax.f32 %v1793_v12, 0.0  ;;  %v5246_v28 = vunpack.c.h.bf16 %v5805_v20  ;;  %v1950_v39 = vmax.f32 %v1937_v25, 0.0 }
 0x295   : > { %6023 = vmatprep.subr.mxu0 %v5130_v29  ;;  %6058 = vmatprep.subr.mxu1 %v5194_v30  ;;  %v5310_v29 = vunpack.c.h.bf16 %v5821_v24  ;;  %v5812_v30 = vld [vmem:[%s6824_s10 + $0x270] sm:$0xff]  }
 0x296   : > { %6024 = vmatpush3.msra.mxu0 %v5098_v31  ;;  %6059 = vmatpush3.msra.mxu1 %v5162_v32  ;;  %v5828_v31 = vld [vmem:[%s6824_s10 + $0x2f0] sm:$0xff]   ;;  %v1948_v32 = vmax.f32 %v1866_v21, 0.0  ;;  %v5273_v49 = vunpack.c.l.bf16 %v5812_v30  ;;  %v5801_v21 = vld [vmem:[%s6824_s10 + $0x218] sm:$0xff]  }
 0x297   : > { %6025 = vmatprep.subr.mxu0 %v5129_v37  ;;  %6060 = vmatprep.subr.mxu1 %v5193_v38  ;;  %v5804_v37 = vld [vmem:[%s6824_s10 + $0x230] sm:$0xff]   ;;  %v5337_v50 = vunpack.c.l.bf16 %v5828_v31 }
 0x298   : > { %6026 = vmatpush3.msra.mxu0 %v5097_v41  ;;  %6061 = vmatpush3.msra.mxu1 %v5161_v42  ;;  %v5820_v38 = vld [vmem:[%s6824_s10 + $0x2b0] sm:$0xff]   ;;  %v5309_v41 = vunpack.c.l.bf16 %v5821_v24  ;;  %v5274_v42 = vunpack.c.h.bf16 %v5812_v30  ;;  %v5817_v24 = vld [vmem:[%s6824_s10 + $0x298] sm:$0xff]  }
 0x299   : > { %6027 = vmatprep.subr.mxu0 %v5126_v43  ;;  %6062 = vmatprep.subr.mxu1 %v5190_v44  ;;  %v5338_v43 = vunpack.c.h.bf16 %v5828_v31  ;;  %v5242_v44 = vunpack.c.h.bf16 %v5804_v37  ;;  %v5305_v61 = vunpack.c.l.bf16 %v5820_v38  ;;  %v5824_v30 = vld [vmem:[%s6824_s10 + $0x2d0] sm:$0xff]   ;;  %v5261_v31 = vunpack.c.l.bf16 %v5809_v17 }
 0x29a   : > { %6028 = vmatpush3.msra.mxu0 %v5094_v46  ;;  %6063 = vmatpush3.msra.mxu1 %v5158_v47  ;;  %v5306_v46 = vunpack.c.h.bf16 %v5820_v38  ;;  %v5811_v47 = vld [vmem:[%s6824_s10 + $0x268] sm:$0xff]   ;;  %v5293_v38 = vunpack.c.l.bf16 %v5817_v24 }
 0x29b   : > { %6029 = vmatprep.subr.mxu0 %v5125_v59  ;;  %6064 = vmatprep.subr.mxu1 %v5189_v60  ;;  %v5819_v59 = vld [vmem:[%s6824_s10 + $0x2a8] sm:$0xff]   ;;  %v5241_v60 = vunpack.c.l.bf16 %v5804_v37  ;;  %v5270_v62 = vunpack.c.h.bf16 %v5811_v47  ;;  %v5269_v7 = vunpack.c.l.bf16 %v5811_v47  ;;  %v5229_v37 = vunpack.c.l.bf16 %v5801_v21 }
 0x29c   : > { %6030 = vmatpush3.msra.mxu0 %v5093_v3  ;;  %6065 = vmatpush3.msra.mxu1 %v5157_v4  ;;  %v5334_v3 = vunpack.c.h.bf16 %v5827_v48  ;;  %v5238_v4 = vunpack.c.h.bf16 %v5803_v57  ;;  %v5302_v5 = vunpack.c.h.bf16 %v5819_v59  ;;  %v5301_v12 = vunpack.c.l.bf16 %v5819_v59  ;;  %v5799_v48 = vld [vmem:[%s6824_s10 + $0x208] sm:$0xff]  }
 0x29d   : > { %6031 = vmatprep.subr.mxu0 %v5122_v54  ;;  %6066 = vmatprep.subr.mxu1 %v5186_v6  ;;  %v5810_v54 = vld [vmem:[%s6824_s10 + $0x260] sm:$0xff]   ;;  %v5321_v47 = vunpack.c.l.bf16 %v5824_v30 }
 0x29e   : > { %6032 = vmatpush3.msra.mxu0 %v5090_v9  ;;  %6067 = vmatpush3.msra.mxu1 %v5154_v10  ;;  %v5826_v6 = vld [vmem:[%s6824_s10 + $0x2e0] sm:$0xff]   ;;  %v5266_v13 = vunpack.c.h.bf16 %v5810_v54 }
 0x29f   : > { %6033 = vmatprep.subr.mxu0 %v5121_v14  ;;  %6068 = vmatprep.subr.mxu1 %v5185_v15  ;;  %v5802_v9 = vld [vmem:[%s6824_s10 + $0x220] sm:$0xff]   ;;  %v5330_v14 = vunpack.c.h.bf16 %v5826_v6  ;;  %v5329_v20 = vunpack.c.l.bf16 %v5826_v6 }
 0x2a0   : > { %6034 = vmatpush3.msra.mxu0 %v5089_v18  ;;  %6069 = vmatpush3.msra.mxu1 %v5153_v19  ;;  %v5818_v10 = vld [vmem:[%s6824_s10 + $0x2a0] sm:$0xff]   ;;  %v5234_v15 = vunpack.c.h.bf16 %v5802_v9  ;;  %v5825_v18 = vld [vmem:[%s6824_s10 + $0x2d8] sm:$0xff]   ;;  %v5265_v19 = vunpack.c.l.bf16 %v5810_v54  ;;  %v5233_v25 = vunpack.c.l.bf16 %v5802_v9  ;;  %v1457_v54 = vrot.slane %v6969_v2, %v6893_v53 }
 0x2a1   : > { %2547 = vmatmul.mubr.f32.vlgmr.msra.gmra.mxu0 %v1943_v26  ;;  %2617 = vmatmul.mubr.f32.vlgmr.msra.gmra.mxu1 %v1945_v27  ;;  %v5298_v16 = vunpack.c.h.bf16 %v5818_v10  ;;  %v5326_v26 = vunpack.c.h.bf16 %v5825_v18  ;;  %v5230_v27 = vunpack.c.h.bf16 %v5801_v21  ;;  %v5814_v9 = vld [vmem:[%s6824_s10 + $0x280] sm:$0xff]  }
 0x2a2   : > { %6073 = vmatprep.subr.mxu0 %v5278_v22  ;;  %6108 = vmatprep.subr.mxu1 %v5342_v23  ;;  %v5297_v22 = vunpack.c.l.bf16 %v5818_v10  ;;  %v5262_v23 = vunpack.c.h.bf16 %v5809_v17  ;;  %v5221_v10 = vunpack.c.l.bf16 %v5799_v48 }
 0x2a3   : > { %6074 = vmatpush3.msra.mxu0 %v5246_v28  ;;  %2686 = vmatprep.mubr.f32.mxu0 %v1948_v32  ;;  %v5294_v28 = vunpack.c.h.bf16 %v5817_v24  ;;  %v5325_v32 = vunpack.c.l.bf16 %v5825_v18 }
 0x2a4   : > { %6109 = vmatpush3.msra.mxu1 %v5310_v29  ;;  %2756 = vmatprep.mubr.f32.mxu1 %v1950_v39  ;;  %v5808_v29 = vld [vmem:[%s6824_s10 + $0x250] sm:$0xff]  }
 0x2a5   : > { %6075 = vmatprep.subr.mxu0 %v5277_v33  ;;  %6110 = vmatprep.subr.mxu1 %v5341_v34  ;;  %v5800_v33 = vld [vmem:[%s6824_s10 + $0x210] sm:$0xff]   ;;  %v5258_v39 = vunpack.c.h.bf16 %v5808_v29 }
 0x2a6   : > { %6076 = vmatpush3.msra.mxu0 %v5245_v40  ;;  %6111 = vmatpush3.msra.mxu1 %v5309_v41  ;;  %v5816_v34 = vld [vmem:[%s6824_s10 + $0x290] sm:$0xff]   ;;  %v5322_v40 = vunpack.c.h.bf16 %v5824_v30  ;;  %v5226_v41 = vunpack.c.h.bf16 %v5800_v33 }
 0x2a7   : > { %6077 = vmatprep.subr.mxu0 %v5274_v42  ;;  %6112 = vmatprep.subr.mxu1 %v5338_v43  ;;  %v5290_v42 = vunpack.c.h.bf16 %v5816_v34  ;;  %v5807_v43 = vld [vmem:[%s6824_s10 + $0x248] sm:$0xff]   ;;  %v5289_v57 = vunpack.c.l.bf16 %v5816_v34 }
 0x2a8   : > { %6078 = vmatpush3.msra.mxu0 %v5242_v44  ;;  %6113 = vmatpush3.msra.mxu1 %v5306_v46  ;;  %v5823_v44 = vld [vmem:[%s6824_s10 + $0x2c8] sm:$0xff]   ;;  %v5257_v46 = vunpack.c.l.bf16 %v5808_v29  ;;  %v5254_v59 = vunpack.c.h.bf16 %v5807_v43  ;;  %v5253_v6 = vunpack.c.l.bf16 %v5807_v43 }
 0x2a9   : > { %6079 = vmatprep.subr.mxu0 %v5273_v49  ;;  %6114 = vmatprep.subr.mxu1 %v5337_v50  ;;  %v5815_v49 = vld [vmem:[%s6824_s10 + $0x288] sm:$0xff]   ;;  %v5225_v50 = vunpack.c.l.bf16 %v5800_v33 }
 0x2aa   : > { %6080 = vmatpush3.msra.mxu0 %v5241_v60  ;;  %6115 = vmatpush3.msra.mxu1 %v5305_v61  ;;  %v5318_v60 = vunpack.c.h.bf16 %v5823_v44  ;;  %v5222_v61 = vunpack.c.h.bf16 %v5799_v48  ;;  %v4923_v48 = vsel %vm2764_vm4, 1.0, %v6514_v0 }
 0x2ab   : > { %6081 = vmatprep.subr.mxu0 %v5270_v62  ;;  %6116 = vmatprep.subr.mxu1 %v5334_v3  ;;  %v5286_v62 = vunpack.c.h.bf16 %v5815_v49  ;;  %v5806_v3 = vld [vmem:[%s6824_s10 + $0x240] sm:$0xff]  }
 0x2ac   : > { %6082 = vmatpush3.msra.mxu0 %v5238_v4  ;;  %6117 = vmatpush3.msra.mxu1 %v5302_v5  ;;  %v5822_v4 = vld [vmem:[%s6824_s10 + $0x2c0] sm:$0xff]   ;;  %v1449_v5 = vrot.slane %v6969_v2, %v6890_v52  ;;  %v5249_v17 = vunpack.c.l.bf16 %v5806_v3 }
 0x2ad   : > { %6083 = vmatprep.subr.mxu0 %v5269_v7  ;;  %6118 = vmatprep.subr.mxu1 %v5333_v8  ;;  %v5317_v7 = vunpack.c.l.bf16 %v5823_v44  ;;  %v5798_v8 = vld [vmem:[%s6824_s10 + $0x200] sm:$0xff]   ;;  %v5313_v18 = vunpack.c.l.bf16 %v5822_v4  ;;  %s1119_s10 = scalar_lea.vmem %s7359_s0, %s6678_s8 }
 0x2ae   : > { %6084 = vmatpush3.msra.mxu0 %v5237_v11  ;;  %6119 = vmatpush3.msra.mxu1 %v5301_v12  ;;  %v5285_v11 = vunpack.c.l.bf16 %v5815_v49  ;;  %v5250_v12 = vunpack.c.h.bf16 %v5806_v3  ;;  %v1864_v2 = vadd.f32 %v6954_v45, %v1449_v5 }
 0x2af   : > { %6085 = vmatprep.subr.mxu0 %v5266_v13  ;;  %6120 = vmatprep.subr.mxu1 %v5330_v14  ;;  %v5314_v13 = vunpack.c.h.bf16 %v5822_v4  ;;  %v5218_v14 = vunpack.c.h.bf16 %v5798_v8 }
 0x2b0   : > { %6086 = vmatpush3.msra.mxu0 %v5234_v15  ;;  %6121 = vmatpush3.msra.mxu1 %v5298_v16  ;;  %v5282_v15 = vunpack.c.h.bf16 %v5814_v9  ;;  %v1935_v16 = vadd.f32 %v6964_v58, %v1457_v54  ;;  %v1947_v21 = vmax.f32 %v1864_v2, 0.0 }
 0x2b1   : > { %6087 = vmatprep.subr.mxu0 %v5265_v19  ;;  %6122 = vmatprep.subr.mxu1 %v5329_v20  ;;  %v5217_v19 = vunpack.c.l.bf16 %v5798_v8  ;;  %v5281_v20 = vunpack.c.l.bf16 %v5814_v9 }
 0x2b2   : > { %6088 = vmatpush3.msra.mxu0 %v5233_v25  ;;  %6123 = vmatpush3.msra.mxu1 %v5297_v22  ;;  %v1949_v24 = vmax.f32 %v1935_v16, 0.0 }
 0x2b3   : > { %6089 = vmatprep.subr.mxu0 %v5262_v23  ;;  %6124 = vmatprep.subr.mxu1 %v5326_v26  ;;  %v4922_v26 = vld [vmem:[%s1116_s5] ss:$0 sm:$0xff] }
 0x2b4   : > { %6090 = vmatpush3.msra.mxu0 %v5230_v27  ;;  %6125 = vmatpush3.msra.mxu1 %v5294_v28 }
 0x2b5   : > { %6091 = vmatprep.subr.mxu0 %v5261_v31  ;;  %6126 = vmatprep.subr.mxu1 %v5325_v32 }
 0x2b6   : > { %6092 = vmatpush3.msra.mxu0 %v5229_v37  ;;  %6127 = vmatpush3.msra.mxu1 %v5293_v38 }
 0x2b7   : > { %6093 = vmatprep.subr.mxu0 %v5258_v39  ;;  %6128 = vmatprep.subr.mxu1 %v5322_v40 }
 0x2b8   : > { %6094 = vmatpush3.msra.mxu0 %v5226_v41  ;;  %6129 = vmatpush3.msra.mxu1 %v5290_v42 }
 0x2b9   : > { %6095 = vmatprep.subr.mxu0 %v5257_v46  ;;  %6130 = vmatprep.subr.mxu1 %v5321_v47 }
 0x2ba   : > { %6096 = vmatpush3.msra.mxu0 %v5225_v50  ;;  %6131 = vmatpush3.msra.mxu1 %v5289_v57 }
 0x2bb   : > { %6097 = vmatprep.subr.mxu0 %v5254_v59  ;;  %6132 = vmatprep.subr.mxu1 %v5318_v60 }
 0x2bc   : > { %6098 = vmatpush3.msra.mxu0 %v5222_v61  ;;  %6133 = vmatpush3.msra.mxu1 %v5286_v62 }
 0x2bd   : > { %6099 = vmatprep.subr.mxu0 %v5253_v6  ;;  %6134 = vmatprep.subr.mxu1 %v5317_v7 }
 0x2be   : > { %6100 = vmatpush3.msra.mxu0 %v5221_v10  ;;  %6135 = vmatpush3.msra.mxu1 %v5285_v11 }
 0x2bf   : > { %6101 = vmatprep.subr.mxu0 %v5250_v12  ;;  %6136 = vmatprep.subr.mxu1 %v5314_v13 }
 0x2c0   : > { %6102 = vmatpush3.msra.mxu0 %v5218_v14  ;;  %6137 = vmatpush3.msra.mxu1 %v5282_v15 }
 0x2c1   : > { %6103 = vmatprep.subr.mxu0 %v5249_v17  ;;  %6138 = vmatprep.subr.mxu1 %v5313_v18  ;;  %v4924_v17 = vld [vmem:[%s1119_s10] ss:$0 sm:$0xff] }
 0x2c2   : > { %6104 = vmatpush3.msra.mxu0 %v5217_v19  ;;  %6139 = vmatpush3.msra.mxu1 %v5281_v20  ;;  %v4925_v19 = vld [vmem:[%s1122_s22] ss:$0 sm:$0xff] }
 0x2c3   : > { %2687 = vmatmul.mubr.f32.vlgmr.msra.gmra.mxu0 %v1947_v21  ;;  %2757 = vmatmul.mubr.f32.vlgmr.msra.gmra.mxu1 %v1949_v24 }
 0x340   : > { %v5965_v45 = vpop.f32.mrf.mxu0  ;;  %v6000_v25 = vpop.f32.mrf.mxu1 }
 0x342   : > { %v5966_v58 = vpop.f32.mrf.mxu0  ;;  %v6001_v27 = vpop.f32.mrf.mxu1 }
 0x343   : > { %v5967_v23 = vadd.f32 %v5966_v58, %v5965_v45  ;;  %v6002_v31 = vadd.f32 %v6001_v27, %v6000_v25 }
 0x345   : > { %v2409_v29 = vadd.f32 %v5967_v23, %v4922_v26 }
 0x347   : > { %v2479_v33 = vadd.f32 %v6002_v31, %v2409_v29 }
 0x361   : > { %v6035_v22 = vpop.f32.mrf.mxu0  ;;  %v6070_v30 = vpop.f32.mrf.mxu1 }
 0x363   : > { %v6036_v28 = vpop.f32.mrf.mxu0  ;;  %v6071_v34 = vpop.f32.mrf.mxu1 }
 0x364   : > { %v6037_v32 = vadd.f32 %v6036_v28, %v6035_v22  ;;  %v6072_v40 = vadd.f32 %v6071_v34, %v6070_v30 }
 0x366   : > { %v2549_v37 = vadd.f32 %v6037_v32, %v2479_v33 }
 0x368   : > { %v2619_v43 = vadd.f32 %v6072_v40, %v2549_v37 }
 0x383   : > { %v6105_v38 = vpop.f32.mrf.mxu0  ;;  %v6140_v39 = vpop.f32.mrf.mxu1 }
 0x385   : > { %v6106_v41 = vpop.f32.mrf.mxu0  ;;  %v6141_v42 = vpop.f32.mrf.mxu1 }
 0x386   : > { %v6107_v44 = vadd.f32 %v6106_v41, %v6105_v38  ;;  %v6142_v47 = vadd.f32 %v6141_v42, %v6140_v39 }
 0x388   : > { %v2689_v46 = vadd.f32 %v6107_v44, %v2619_v43 }
 0x38a   : > { %v2759_v49 = vadd.f32 %v6142_v47, %v2689_v46 }
 0x38c   : > { %v2767_v50 = vmul.f32 %v4923_v48, %v2759_v49 }
 0x38e   : > { %v2769_v57 = vsel %vm2768_vm5, %v2767_v50, 0.0 }
 0x38f   : > { %v2770_v59 = vrot.slane %v2769_v57, 4 }
 0x391   : > { %v2771_v60 = vadd.f32 %v2770_v59, %v2769_v57 }
 0x393   : > { %v2772_v61 = vrot.slane %v2771_v60, 2 }
 0x395   : > { %v2773_v62 = vadd.f32 %v2772_v61, %v2771_v60 }
 0x397   : > { %v2774_v3 = vrot.slane %v2773_v62, 1 }
 0x399   : > { %v2775_v4 = vadd.f32 %v2774_v3, %v2773_v62 }
 0x39b   : > { %v2776_v5 = vmul.f32 0.16666667, %v2775_v4 }
 0x39d   : > { %v2777_v54 = vsub.f32 %v2759_v49, %v2776_v5 }
 0x39f   : > { %v2778_v6 = vmul.f32 %v4923_v48, %v2777_v54 }
 0x3a1   : > { %v2779_v7 = vmul.f32 %v2778_v6, %v2778_v6 }
 0x3a3   : > { %v2780_v8 = vsel %vm2768_vm5, %v2779_v7, 0.0 }
 0x3a4   : > { %v2781_v9 = vrot.slane %v2780_v8, 4 }
 0x3a6   : > { %v2782_v10 = vadd.f32 %v2781_v9, %v2780_v8 }
 0x3a8   : > { %v2783_v11 = vrot.slane %v2782_v10, 2 }
 0x3aa   : > { %v2784_v12 = vadd.f32 %v2783_v11, %v2782_v10 }
 0x3ac   : > { %v2785_v13 = vrot.slane %v2784_v12, 1 }
 0x3ae   : > { %v2786_v14 = vadd.f32 %v2785_v13, %v2784_v12 }
 0x3b0   : > { %v2787_v15 = vmul.f32 0.16666667, %v2786_v14 }
 0x3b2   : > { %v2788_v2 = vadd.f32 1e-05, %v2787_v15 }
 0x3b4   : > { %6444 = vrsqrt.f32 %v2788_v2 }
 0x3c1   : > { %v6445_v16 = vpop.eup %6444 }
 0x3c2   : > { %v2790_v18 = vmul.f32 %v6445_v16, %v2777_v54 }
 0x3c4   : > { %v2798_v20 = vmul.f32 %v4924_v17, %v2790_v18  ;;  %2811 = sbr.rel (%p4926_p4) target bundleno = 972 (0x3cc), region = 120 }
 0x3c6   : > { %v7035_v21 = vadd.f32 %v4925_v19, %v2798_v20 }
 0x3c8   : > { %2807 = vst.msk [vmem:[%s1170_s2] sm:$0xff] %vm2768_vm5, %v7035_v21 }
 0x3c9   : > { %vm2813_vm6 = vcmask 7168   ;;  %v6516_v24 = vmov 0.0  }
 0x3ca   : > { %2812 = vst.msk [vmem:[#allocation2] sm:$0xff] %vm2768_vm5, %v6516_v24 }
 0x3cb   : > { %2814 = vst.msk [vmem:[#allocation3] sm:$0xff] %vm2813_vm6, %v6516_v24 }
 0x3cc PF: > { %6383 = vmatprep.subr.mxu0 %v6514_v0  ;;  %v2829_v45 = vld [vmem:[%s6691_s29] sm:$0xf]  ;;  %6385 = vmatprep.mubr.msk.f32.mxu0 %vm6515_vm0, %v6514_v0  ;;  %v2913_v25 = vld [vmem:[%s6718_s11 + $0x8] sm:$0xff]  ;;  %v2914_v29 = vld [vmem:[%s6718_s11 + $0x10] sm:$0xff]  ;;  %s7361_s13 = scalar_lea.vmem %s7305_s12, %s6678_s8  ;;  %vm2827_vm7 = vcmask 7168   ;;  %s7363_s10 = scalar_lea.vmem %s7311_s18, %s6678_s8 }
 0x3cd   : > { %v2830_v58 = vunpack.c.l.bf16 %v2829_v45  ;;  %3061 = vmatprep.mubr.f32.mxu1 %v6514_v0  ;;  %v2912_v22 = vld [vmem:[%s6718_s11] sm:$0xff]  ;;  %v2921_v23 = vunpack.c.h.bf16 %v2913_v25  ;;  %v2920_v27 = vunpack.c.l.bf16 %v2913_v25  ;;  %v2915_v30 = vld [vmem:[%s6718_s11 + $0x18] sm:$0xff]  ;;  %v2923_v31 = vunpack.c.h.bf16 %v2914_v29  ;;  %v2917_v39 = vld [vmem:[%s6718_s11 + $0x28] sm:$0xff]  ;;  %s7364_s7 = scalar_lea.vmem %s7313_s20, %s6678_s8  ;;  %p4942_p5 = scmp.ne.s32.totalorder %s6669_s4, 1 }
 0x3ce   : > { %v2919_v26 = vunpack.c.h.bf16 %v2912_v22  ;;  %v2918_v28 = vunpack.c.l.bf16 %v2912_v22  ;;  %v2925_v32 = vunpack.c.h.bf16 %v2915_v30  ;;  %v4927_v33 = vld [vmem:[%s7361_s13] ss:$0 sm:$0xff]  ;;  %v2922_v41 = vunpack.c.l.bf16 %v2914_v29  ;;  %v5844_v47 = vld [vmem:[%s6713_s1 + $0x78] sm:$0xff]   ;;  %v5843_v4 = vld [vmem:[%s6713_s1 + $0x70] sm:$0xff]   ;;  %s7366_s2 = sld [smem:[#allocation28_spill]] (!%p4942_p5) }
 0x3cf   : > { %6384 = vmatpush3.msra.mxu0 %v2830_v58  ;;  %v2916_v38 = vld [vmem:[%s6718_s11 + $0x20] sm:$0xff]  ;;  %v2924_v43 = vunpack.c.l.bf16 %v2915_v30  ;;  %v2929_v46 = vunpack.c.h.bf16 %v2917_v39  ;;  %v5860_v48 = vld [vmem:[%s6713_s1 + $0xf8] sm:$0xff]   ;;  %v2928_v50 = vunpack.c.l.bf16 %v2917_v39  ;;  %v5406_v60 = vunpack.c.h.bf16 %v5844_v47  ;;  %v5859_v5 = vld [vmem:[%s6713_s1 + $0xf0] sm:$0xff]   ;;  %s7362_s11 = scalar_lea.vmem %s7309_s16, %s6678_s8  ;;  %s7365_s8 = sld [smem:[#allocation27_spill]] (!%p4942_p5) }
 0x3d0   : > { %6386 = vmatmul.mubr.msk.f32.vlgmr.msra.gmra.mxu0 %vm2768_vm5, %v7035_v21  ;;  %3098 = vmatprep.subr.mxu0 %v2921_v23  ;;  %v2927_v44 = vunpack.c.h.bf16 %v2916_v38  ;;  %v2926_v49 = vunpack.c.l.bf16 %v2916_v38  ;;  %v5836_v57 = vld [vmem:[%s6713_s1 + $0x38] sm:$0xff]   ;;  %v5470_v61 = vunpack.c.h.bf16 %v5860_v48  ;;  %v5405_v54 = vunpack.c.l.bf16 %v5844_v47  ;;  %v5835_v7 = vld [vmem:[%s6713_s1 + $0x30] sm:$0xff]   ;;  %v5842_v15 = vld [vmem:[%s6713_s1 + $0x68] sm:$0xff]  }
 0x3d1   : > { %3132 = vmatprep.mubr.f32.mxu0 %v6514_v0  ;;  %3027 = vmatprep.subr.mxu1 %v2919_v26  ;;  %v5852_v59 = vld [vmem:[%s6713_s1 + $0xb8] sm:$0xff]   ;;  %v5374_v62 = vunpack.c.h.bf16 %v5836_v57  ;;  %v5469_v6 = vunpack.c.l.bf16 %v5860_v48  ;;  %v5851_v8 = vld [vmem:[%s6713_s1 + $0xb0] sm:$0xff]   ;;  %v5373_v9 = vunpack.c.l.bf16 %v5836_v57  ;;  %v5402_v11 = vunpack.c.h.bf16 %v5843_v4  ;;  %v5858_v2 = vld [vmem:[%s6713_s1 + $0xe8] sm:$0xff]  }
 0x3d2   : > { %3099 = vmatpush1.msra.mxu0 %v2920_v27  ;;  %3028 = vmatpush1.msra.mxu1 %v2918_v28  ;;  %v5438_v3 = vunpack.c.h.bf16 %v5852_v59  ;;  %v5437_v10 = vunpack.c.l.bf16 %v5852_v59  ;;  %v5466_v12 = vunpack.c.h.bf16 %v5859_v5  ;;  %v5370_v13 = vunpack.c.h.bf16 %v5835_v7  ;;  %v5834_v18 = vld [vmem:[%s6713_s1 + $0x28] sm:$0xff]   ;;  %v5841_v23 = vld [vmem:[%s6713_s1 + $0x60] sm:$0xff]   ;;  %v5840_v39 = vld [vmem:[%s6713_s1 + $0x58] sm:$0xff]  }
 0x3d3   : > { %3169 = vmatprep.subr.mxu1 %v2923_v31  ;;  %3240 = vmatprep.subr.mxu0 %v2925_v32  ;;  %v5434_v14 = vunpack.c.h.bf16 %v5851_v8  ;;  %v5401_v16 = vunpack.c.l.bf16 %v5843_v4  ;;  %v5465_v17 = vunpack.c.l.bf16 %v5859_v5  ;;  %v5850_v19 = vld [vmem:[%s6713_s1 + $0xa8] sm:$0xff]   ;;  %v5369_v20 = vunpack.c.l.bf16 %v5835_v7  ;;  %v5857_v26 = vld [vmem:[%s6713_s1 + $0xe0] sm:$0xff]   ;;  %v5839_v59 = vld [vmem:[%s6713_s1 + $0x50] sm:$0xff]  }
 0x3d4   : > { %v5433_v24 = vunpack.c.l.bf16 %v5851_v8  ;;  %v5398_v45 = vunpack.c.h.bf16 %v5842_v15  ;;  %v5462_v58 = vunpack.c.h.bf16 %v5858_v2  ;;  %v5366_v25 = vunpack.c.h.bf16 %v5834_v18  ;;  %v5833_v29 = vld [vmem:[%s6713_s1 + $0x20] sm:$0xff]   ;;  %v5847_v4 = vld [vmem:[%s6713_s1 + $0x90] sm:$0xff]  }
 0x3d5   : > { %v5430_v22 = vunpack.c.h.bf16 %v5850_v19  ;;  %v5397_v27 = vunpack.c.l.bf16 %v5842_v15  ;;  %v5461_v28 = vunpack.c.l.bf16 %v5858_v2  ;;  %v5849_v30 = vld [vmem:[%s6713_s1 + $0xa0] sm:$0xff]   ;;  %v5365_v31 = vunpack.c.l.bf16 %v5834_v18  ;;  %v5846_v18 = vld [vmem:[%s6713_s1 + $0x88] sm:$0xff]  }
 0x3d6   : > { %v5429_v32 = vunpack.c.l.bf16 %v5850_v19  ;;  %v5426_v38 = vunpack.c.h.bf16 %v5849_v30  ;;  %v5425_v47 = vunpack.c.l.bf16 %v5849_v30  ;;  %v5390_v48 = vunpack.c.h.bf16 %v5840_v39 }
 0x3d7   : > { %v5417_v15 = vunpack.c.l.bf16 %v5847_v4 }
 0x490   : > { %v2907_v34 = vpop.f32.mrf.mxu0 }
 0x491   : > { %v2908_v37 = vadd.f32 %v4927_v33, %v2907_v34  ;;  %v5394_v33 = vunpack.c.h.bf16 %v5841_v23  ;;  %v5458_v34 = vunpack.c.h.bf16 %v5857_v26 }
 0x492   : > { %v6387_v40 = vpop.f32.mrf.mxu0 }
 0x493   : > { %v2911_v42 = vmax.f32 %v2908_v37, 0.0  ;;  %v5362_v37 = vunpack.c.h.bf16 %v5833_v29  ;;  %v5856_v40 = vld [vmem:[%s6713_s1 + $0xd8] sm:$0xff]  }
 0x495   : > { %4929 = vmatmul.mubr.msk.f32.vlgmr.msra.gmra.mxu1 %vm2768_vm5, %v2911_v42  ;;  %4930 = vmatmul.mubr.msk.f32.vlgmr.msra.gmra.mxu0 %vm2768_vm5, %v2911_v42 }
 0x496   : > { %3170 = vmatpush1.msra.mxu1 %v2922_v41  ;;  %3203 = vmatprep.mubr.f32.mxu1 %v6514_v0  ;;  %v5393_v41 = vunpack.c.l.bf16 %v5841_v23  ;;  %v5853_v23 = vld [vmem:[%s6713_s1 + $0xc0] sm:$0xff]  }
 0x497   : > { %3241 = vmatpush1.msra.mxu0 %v2924_v43  ;;  %3274 = vmatprep.mubr.f32.mxu0 %v6514_v0  ;;  %v5832_v43 = vld [vmem:[%s6713_s1 + $0x18] sm:$0xff]  }
 0x498   : > { %3311 = vmatprep.subr.mxu1 %v2927_v44  ;;  %3382 = vmatprep.subr.mxu0 %v2929_v46  ;;  %v5848_v44 = vld [vmem:[%s6713_s1 + $0x98] sm:$0xff]   ;;  %v5361_v46 = vunpack.c.l.bf16 %v5833_v29  ;;  %v5357_v5 = vunpack.c.l.bf16 %v5832_v43  ;;  %v5845_v29 = vld [vmem:[%s6713_s1 + $0x80] sm:$0xff]  }
 0x499   : > { %4931 = vmatmul.mubr.msk.f32.vlgmr.msra.gmra.mxu1 %vm2768_vm5, %v2911_v42  ;;  %4932 = vmatmul.mubr.msk.f32.vlgmr.msra.gmra.mxu0 %vm2768_vm5, %v2911_v42  ;;  %v5422_v57 = vunpack.c.h.bf16 %v5848_v44 }
 0x49a   : > { %3312 = vmatpush1.msra.mxu1 %v2926_v49  ;;  %3345 = vmatprep.mubr.f32.mxu1 %v6514_v0  ;;  %v5454_v49 = vunpack.c.h.bf16 %v5856_v40 }
 0x49b   : > { %3383 = vmatpush1.msra.mxu0 %v2928_v50  ;;  %3416 = vmatprep.mubr.f32.mxu0 %v6514_v0  ;;  %v5358_v50 = vunpack.c.h.bf16 %v5832_v43 }
 0x49c   : > { %6145 = vmatprep.subr.mxu1 %v5406_v60  ;;  %6180 = vmatprep.subr.mxu0 %v5470_v61  ;;  %v5855_v60 = vld [vmem:[%s6713_s1 + $0xd0] sm:$0xff]   ;;  %v5389_v61 = vunpack.c.l.bf16 %v5840_v39  ;;  %v5892_v39 = vld [vmem:[%s6713_s1 + $0x1f8] sm:$0xff]  }
 0x49d   : > { %4933 = vmatmul.mubr.msk.f32.vlgmr.msra.gmra.mxu1 %vm2768_vm5, %v2911_v42  ;;  %4934 = vmatmul.mubr.msk.f32.vlgmr.msra.gmra.mxu0 %vm2768_vm5, %v2911_v42  ;;  %v5457_v42 = vunpack.c.l.bf16 %v5857_v26  ;;  %v5450_v7 = vunpack.c.h.bf16 %v5855_v60 }
 0x49e   : > { %6146 = vmatpush3.msra.mxu1 %v5374_v62  ;;  %6181 = vmatpush3.msra.mxu0 %v5438_v3  ;;  %v5453_v62 = vunpack.c.l.bf16 %v5856_v40  ;;  %v5831_v3 = vld [vmem:[%s6713_s1 + $0x10] sm:$0xff]  }
 0x49f   : > { %6147 = vmatprep.subr.mxu1 %v5405_v54  ;;  %6182 = vmatprep.subr.mxu0 %v5469_v6  ;;  %v5421_v54 = vunpack.c.l.bf16 %v5848_v44  ;;  %v5386_v6 = vunpack.c.h.bf16 %v5839_v59  ;;  %v5354_v8 = vunpack.c.h.bf16 %v5831_v3 }
 0x4a0   : > { %6148 = vmatpush3.msra.mxu1 %v5373_v9  ;;  %6183 = vmatpush3.msra.mxu0 %v5437_v10  ;;  %v5418_v9 = vunpack.c.h.bf16 %v5847_v4  ;;  %v5838_v10 = vld [vmem:[%s6713_s1 + $0x48] sm:$0xff]  }
 0x4a1   : > { %6149 = vmatprep.subr.mxu1 %v5402_v11  ;;  %6184 = vmatprep.subr.mxu0 %v5466_v12  ;;  %v5854_v11 = vld [vmem:[%s6713_s1 + $0xc8] sm:$0xff]   ;;  %v5385_v12 = vunpack.c.l.bf16 %v5839_v59  ;;  %v5382_v2 = vunpack.c.h.bf16 %v5838_v10 }
 0x4a2   : > { %6150 = vmatpush3.msra.mxu1 %v5370_v13  ;;  %6185 = vmatpush3.msra.mxu0 %v5434_v14  ;;  %v5449_v13 = vunpack.c.l.bf16 %v5855_v60  ;;  %v5353_v14 = vunpack.c.l.bf16 %v5831_v3 }
 0x4a3   : > { %6151 = vmatprep.subr.mxu1 %v5401_v16  ;;  %6186 = vmatprep.subr.mxu0 %v5465_v17  ;;  %v5446_v16 = vunpack.c.h.bf16 %v5854_v11  ;;  %v5830_v17 = vld [vmem:[%s6713_s1 + $0x8] sm:$0xff]  }
 0x4a4   : > { %6152 = vmatpush3.msra.mxu1 %v5369_v20  ;;  %6187 = vmatpush3.msra.mxu0 %v5433_v24  ;;  %v5350_v19 = vunpack.c.h.bf16 %v5830_v17  ;;  %v5414_v20 = vunpack.c.h.bf16 %v5846_v18  ;;  %v5381_v24 = vunpack.c.l.bf16 %v5838_v10 }
 0x4a5   : > { %6153 = vmatprep.subr.mxu1 %v5398_v45  ;;  %6188 = vmatprep.subr.mxu0 %v5462_v58  ;;  %v5445_v45 = vunpack.c.l.bf16 %v5854_v11  ;;  %v5349_v58 = vunpack.c.l.bf16 %v5830_v17  ;;  %v5891_v17 = vld [vmem:[%s6713_s1 + $0x1f0] sm:$0xff]  }
 0x4a6   : > { %6154 = vmatpush3.msra.mxu1 %v5366_v25  ;;  %6189 = vmatpush3.msra.mxu0 %v5430_v22  ;;  %v5413_v25 = vunpack.c.l.bf16 %v5846_v18  ;;  %v5837_v22 = vld [vmem:[%s6713_s1 + $0x40] sm:$0xff]  }
 0x4a7   : > { %6155 = vmatprep.subr.mxu1 %v5397_v27  ;;  %6190 = vmatprep.subr.mxu0 %v5461_v28  ;;  %v5378_v26 = vunpack.c.h.bf16 %v5837_v22  ;;  %v5442_v27 = vunpack.c.h.bf16 %v5853_v23  ;;  %v5344_v28 = vld [vmem:[%s6713_s1] sm:$0xff]  }
 0x4a8   : > { %6156 = vmatpush3.msra.mxu1 %v5365_v31  ;;  %6191 = vmatpush3.msra.mxu0 %v5429_v32  ;;  %v5346_v30 = vunpack.c.h.bf16 %v5344_v28  ;;  %v5410_v31 = vunpack.c.h.bf16 %v5845_v29  ;;  %v5377_v32 = vunpack.c.l.bf16 %v5837_v22 }
 0x4a9   : > { %6157 = vmatprep.subr.mxu1 %v5394_v33  ;;  %6192 = vmatprep.subr.mxu0 %v5458_v34  ;;  %v5441_v33 = vunpack.c.l.bf16 %v5853_v23  ;;  %v5345_v34 = vunpack.c.l.bf16 %v5344_v28  ;;  %v5594_v23 = vunpack.c.h.bf16 %v5891_v17  ;;  %v5874_v28 = vld [vmem:[%s6713_s1 + $0x168] sm:$0xff]  }
 0x4aa   : > { %6158 = vmatpush3.msra.mxu1 %v5362_v37  ;;  %6193 = vmatpush3.msra.mxu0 %v5426_v38  ;;  %v5409_v37 = vunpack.c.l.bf16 %v5845_v29  ;;  %v5876_v38 = vld [vmem:[%s6713_s1 + $0x178] sm:$0xff]   ;;  %v5890_v29 = vld [vmem:[%s6713_s1 + $0x1e8] sm:$0xff]  }
 0x4ab   : > { %6159 = vmatprep.subr.mxu1 %v5393_v41  ;;  %6194 = vmatprep.subr.mxu0 %v5457_v42  ;;  %v5534_v40 = vunpack.c.h.bf16 %v5876_v38  ;;  %v5598_v41 = vunpack.c.h.bf16 %v5892_v39  ;;  %v7105_v42 = vld [vmem:[%s6706_s28] sm:$0xff] }
 0x4ac   : > { %6160 = vmatpush3.msra.mxu1 %v5361_v46  ;;  %6195 = vmatpush3.msra.mxu0 %v5425_v47  ;;  %v2937_v43 = vrot.slane %v7105_v42, %v6890_v52  ;;  %v2945_v44 = vrot.slane %v7105_v42, %v6893_v53  ;;  %v2941_v46 = vrot.slane %v7105_v42, %v6899_v55 }
 0x4ad   : > { %6161 = vmatprep.subr.mxu1 %v5390_v48  ;;  %6196 = vmatprep.subr.mxu0 %v5454_v49  ;;  %v2949_v47 = vrot.slane %v7105_v42, %v6902_v56 }
 0x4ae   : > { %6162 = vmatpush3.msra.mxu1 %v5358_v50  ;;  %6197 = vmatpush3.msra.mxu0 %v5422_v57 }
 0x4af   : > { %6163 = vmatprep.subr.mxu1 %v5389_v61  ;;  %6198 = vmatprep.subr.mxu0 %v5453_v62  ;;  %v5868_v61 = vld [vmem:[%s6713_s1 + $0x138] sm:$0xff]  }
 0x4b0   : > { %6164 = vmatpush3.msra.mxu1 %v5357_v5  ;;  %6199 = vmatpush3.msra.mxu0 %v5421_v54  ;;  %v5884_v62 = vld [vmem:[%s6713_s1 + $0x1b8] sm:$0xff]   ;;  %v2957_v5 = vrot.slane %v7105_v42, %v1436_v63  ;;  %v2965_v54 = vrot.slane %v7105_v42, %v1444_v1  ;;  %v5502_v10 = vunpack.c.h.bf16 %v5868_v61  ;;  %v5533_v63 = vunpack.c.l.bf16 %v5876_v38 }
 0x4b1   : > { %6165 = vmatprep.subr.mxu1 %v5386_v6  ;;  %6200 = vmatprep.subr.mxu0 %v5450_v7  ;;  %v5566_v11 = vunpack.c.h.bf16 %v5884_v62  ;;  %v5526_v38 = vunpack.c.h.bf16 %v5874_v28 }
 0x4b2   : > { %6166 = vmatpush3.msra.mxu1 %v5354_v8  ;;  %6201 = vmatpush3.msra.mxu0 %v5418_v9 }
 0x4b3   : > { %6167 = vmatprep.subr.mxu1 %v5385_v12  ;;  %6202 = vmatprep.subr.mxu0 %v5449_v13  ;;  %v5875_v12 = vld [vmem:[%s6713_s1 + $0x170] sm:$0xff]  }
 0x4b4   : > { %6168 = vmatpush3.msra.mxu1 %v5353_v14  ;;  %6203 = vmatpush3.msra.mxu0 %v5417_v15 }
 0x4b5   : > { %6169 = vmatprep.subr.mxu1 %v5382_v2  ;;  %6204 = vmatprep.subr.mxu0 %v5446_v16  ;;  %v5597_v16 = vunpack.c.l.bf16 %v5892_v39  ;;  %v5590_v39 = vunpack.c.h.bf16 %v5890_v29 }
 0x4b6   : > { %6170 = vmatpush3.msra.mxu1 %v5350_v19  ;;  %6205 = vmatpush3.msra.mxu0 %v5414_v20  ;;  %v5501_v19 = vunpack.c.l.bf16 %v5868_v61  ;;  %v5565_v20 = vunpack.c.l.bf16 %v5884_v62 }
 0x4b7   : > { %6171 = vmatprep.subr.mxu1 %v5381_v24  ;;  %6206 = vmatprep.subr.mxu0 %v5445_v45  ;;  %v5867_v24 = vld [vmem:[%s6713_s1 + $0x130] sm:$0xff]  }
 0x4b8   : > { %6172 = vmatpush3.msra.mxu1 %v5349_v58  ;;  %6207 = vmatpush3.msra.mxu0 %v5413_v25  ;;  %v5883_v45 = vld [vmem:[%s6713_s1 + $0x1b0] sm:$0xff]   ;;  %v5530_v58 = vunpack.c.h.bf16 %v5875_v12 }
 0x4b9   : > { %6173 = vmatprep.subr.mxu1 %v5378_v26  ;;  %6208 = vmatprep.subr.mxu0 %v5442_v27  ;;  %v5498_v26 = vunpack.c.h.bf16 %v5867_v24  ;;  %v5562_v27 = vunpack.c.h.bf16 %v5883_v45 }
 0x4ba   : > { %6174 = vmatpush3.msra.mxu1 %v5346_v30  ;;  %6209 = vmatpush3.msra.mxu0 %v5410_v31  ;;  %v5529_v30 = vunpack.c.l.bf16 %v5875_v12  ;;  %v5593_v31 = vunpack.c.l.bf16 %v5891_v17 }
 0x4bb   : > { %6175 = vmatprep.subr.mxu1 %v5377_v32  ;;  %6210 = vmatprep.subr.mxu0 %v5441_v33  ;;  %v5866_v32 = vld [vmem:[%s6713_s1 + $0x128] sm:$0xff]  }
 0x4bc   : > { %6176 = vmatpush3.msra.mxu1 %v5345_v34  ;;  %6211 = vmatpush3.msra.mxu0 %v5409_v37  ;;  %v5882_v33 = vld [vmem:[%s6713_s1 + $0x1a8] sm:$0xff]   ;;  %v5497_v34 = vunpack.c.l.bf16 %v5867_v24  ;;  %v5561_v37 = vunpack.c.l.bf16 %v5883_v45 }
 0x4bd   : > { %6215 = vmatprep.subr.mxu1 %v5534_v40  ;;  %6250 = vmatprep.subr.mxu0 %v5598_v41  ;;  %v5494_v40 = vunpack.c.h.bf16 %v5866_v32  ;;  %v5558_v41 = vunpack.c.h.bf16 %v5882_v33 }
 0x555   : > { %v3063_v48 = vpop.f32.mrf.mxu1  ;;  %v3134_v49 = vpop.f32.mrf.mxu0 }
 0x556   : > { %v3064_v50 = vadd.f32 %v3063_v48, %v2937_v43  ;;  %v3135_v57 = vadd.f32 %v3134_v49, %v2945_v44  ;;  %v5873_v43 = vld [vmem:[%s6713_s1 + $0x160] sm:$0xff]  }
 0x557   : > { %v3065_v59 = vpop.f32.mrf.mxu1  ;;  %v3136_v60 = vpop.f32.mrf.mxu0  ;;  %v5889_v44 = vld [vmem:[%s6713_s1 + $0x1e0] sm:$0xff]  }
 0x558   : > { %v3066_v3 = vadd.f32 %v3065_v59, %v2941_v46  ;;  %v3137_v4 = vadd.f32 %v3136_v60, %v2949_v47  ;;  %v3423_v13 = vmax.f32 %v3064_v50, 0.0  ;;  %v3425_v14 = vmax.f32 %v3135_v57, 0.0  ;;  %v5865_v48 = vld [vmem:[%s6713_s1 + $0x120] sm:$0xff]  }
 0x559   : > { %v7123_v6 = vpop.f32.mrf.mxu1  ;;  %v7125_v7 = vpop.f32.mrf.mxu0  ;;  %v5525_v46 = vunpack.c.l.bf16 %v5874_v28  ;;  %v5589_v47 = vunpack.c.l.bf16 %v5890_v29  ;;  %v5881_v49 = vld [vmem:[%s6713_s1 + $0x1a0] sm:$0xff]   ;;  %v5493_v50 = vunpack.c.l.bf16 %v5866_v32  ;;  %v5557_v57 = vunpack.c.l.bf16 %v5882_v33  ;;  %v5862_v28 = vld [vmem:[%s6713_s1 + $0x108] sm:$0xff]  }
 0x55a   : > { %v3424_v8 = vmax.f32 %v3066_v3, 0.0  ;;  %v3426_v9 = vmax.f32 %v3137_v4, 0.0  ;;  %v5522_v59 = vunpack.c.h.bf16 %v5873_v43  ;;  %v5586_v60 = vunpack.c.h.bf16 %v5889_v44  ;;  %v5872_v3 = vld [vmem:[%s6713_s1 + $0x158] sm:$0xff]   ;;  %v5878_v29 = vld [vmem:[%s6713_s1 + $0x188] sm:$0xff]  }
 0x55b   : > { %v3207_v15 = vpop.f32.mrf.mxu1  ;;  %v3278_v2 = vpop.f32.mrf.mxu0  ;;  %v5490_v61 = vunpack.c.h.bf16 %v5865_v48  ;;  %v5554_v62 = vunpack.c.h.bf16 %v5881_v49  ;;  %v5888_v4 = vld [vmem:[%s6713_s1 + $0x1d8] sm:$0xff]   ;;  %v5518_v12 = vunpack.c.h.bf16 %v5872_v3 }
 0x55c   : > { %v3208_v18 = vadd.f32 %v3207_v15, %v2957_v5  ;;  %v3279_v1 = vadd.f32 %v3278_v2, %v2965_v54  ;;  %3890 = vmatprep.mubr.f32.mxu1 %v3424_v8  ;;  %3960 = vmatprep.mubr.f32.mxu0 %v3426_v9  ;;  %v5521_v5 = vunpack.c.l.bf16 %v5873_v43  ;;  %v5585_v54 = vunpack.c.l.bf16 %v5889_v44  ;;  %v5864_v8 = vld [vmem:[%s6713_s1 + $0x118] sm:$0xff]   ;;  %v5871_v2 = vld [vmem:[%s6713_s1 + $0x150] sm:$0xff]  }
 0x55d   : > { %3891 = vmatmul.mubr.f32.vlgmr.msra.gmra.mxu1 %v3423_v13  ;;  %3961 = vmatmul.mubr.f32.vlgmr.msra.gmra.mxu0 %v3425_v14  ;;  %v5880_v9 = vld [vmem:[%s6713_s1 + $0x198] sm:$0xff]   ;;  %v5582_v13 = vunpack.c.h.bf16 %v5888_v4  ;;  %v5486_v14 = vunpack.c.h.bf16 %v5864_v8  ;;  %v5581_v17 = vunpack.c.l.bf16 %v5888_v4  ;;  %v5514_v24 = vunpack.c.h.bf16 %v5871_v2  ;;  %v7161_v44 = vpop.f32.mrf.mxu0 }
 0x55e   : > { %v3428_v25 = vmax.f32 %v3208_v18, 0.0  ;;  %v3430_v22 = vmax.f32 %v3279_v1, 0.0  ;;  %6216 = vmatpush3.msra.mxu1 %v5502_v10  ;;  %6251 = vmatpush3.msra.mxu0 %v5566_v11  ;;  %v5489_v10 = vunpack.c.l.bf16 %v5865_v48  ;;  %v5553_v11 = vunpack.c.l.bf16 %v5881_v49  ;;  %v5863_v18 = vld [vmem:[%s6713_s1 + $0x110] sm:$0xff]   ;;  %v5861_v48 = vld [vmem:[%s6713_s1 + $0x100] sm:$0xff]  }
 0x55f   : > { %6217 = vmatprep.subr.mxu1 %v5533_v63  ;;  %6252 = vmatprep.subr.mxu0 %v5597_v16  ;;  %v5550_v15 = vunpack.c.h.bf16 %v5880_v9  ;;  %v5887_v63 = vld [vmem:[%s6713_s1 + $0x1d0] sm:$0xff]   ;;  %v5517_v16 = vunpack.c.l.bf16 %v5872_v3  ;;  %v2961_v43 = vrot.slane %v7105_v42, %v1440_v36  ;;  %v5877_v49 = vld [vmem:[%s6713_s1 + $0x180] sm:$0xff]  }
 0x560   : > { %6218 = vmatpush3.msra.mxu1 %v5501_v19  ;;  %6253 = vmatpush3.msra.mxu0 %v5565_v20  ;;  %v5879_v1 = vld [vmem:[%s6713_s1 + $0x190] sm:$0xff]   ;;  %v5485_v19 = vunpack.c.l.bf16 %v5864_v8  ;;  %v5549_v20 = vunpack.c.l.bf16 %v5880_v9  ;;  %v5578_v45 = vunpack.c.h.bf16 %v5887_v63  ;;  %v5908_v8 = vld [vmem:[%s6713_s1 + $0x278] sm:$0xff]  }
 0x561   : > { %6219 = vmatprep.subr.mxu1 %v5530_v58  ;;  %4030 = vmatprep.mubr.f32.mxu1 %v3428_v25  ;;  %v5482_v58 = vunpack.c.h.bf16 %v5863_v18  ;;  %v5546_v25 = vunpack.c.h.bf16 %v5879_v1  ;;  %v3277_v4 = vadd.f32 %v7125_v7, %v2961_v43  ;;  %v5924_v9 = vld [vmem:[%s6713_s1 + $0x2f8] sm:$0xff]  }
 0x562   : > { %6254 = vmatprep.subr.mxu0 %v5594_v23  ;;  %4100 = vmatprep.mubr.f32.mxu0 %v3430_v22  ;;  %v5870_v22 = vld [vmem:[%s6713_s1 + $0x148] sm:$0xff]  }
 0x563   : > { %6220 = vmatpush3.msra.mxu1 %v5498_v26  ;;  %6255 = vmatpush3.msra.mxu0 %v5562_v27  ;;  %v5886_v23 = vld [vmem:[%s6713_s1 + $0x1c8] sm:$0xff]   ;;  %v5513_v26 = vunpack.c.l.bf16 %v5871_v2  ;;  %v5577_v27 = vunpack.c.l.bf16 %v5887_v63  ;;  %v5510_v32 = vunpack.c.h.bf16 %v5870_v22  ;;  %v3429_v2 = vmax.f32 %v3277_v4, 0.0  ;;  %v5920_v4 = vld [vmem:[%s6713_s1 + $0x2d8] sm:$0xff]  }
 0x564   : > { %6221 = vmatprep.subr.mxu1 %v5529_v30  ;;  %6256 = vmatprep.subr.mxu0 %v5593_v31  ;;  %v5481_v30 = vunpack.c.l.bf16 %v5863_v18  ;;  %v5545_v31 = vunpack.c.l.bf16 %v5879_v1  ;;  %v5574_v33 = vunpack.c.h.bf16 %v5886_v23  ;;  %v5923_v18 = vld [vmem:[%s6713_s1 + $0x2f0] sm:$0xff]  }
 0x565   : > { %6222 = vmatpush3.msra.mxu1 %v5497_v34  ;;  %6257 = vmatpush3.msra.mxu0 %v5561_v37  ;;  %v7151_v34 = vpop.f32.mrf.mxu1  ;;  %v5478_v37 = vunpack.c.h.bf16 %v5862_v28 }
 0x566   : > { %6223 = vmatprep.subr.mxu1 %v5526_v38  ;;  %6258 = vmatprep.subr.mxu0 %v5590_v39  ;;  %v5542_v38 = vunpack.c.h.bf16 %v5878_v29  ;;  %v5869_v39 = vld [vmem:[%s6713_s1 + $0x140] sm:$0xff]  }
 0x567   : > { %6224 = vmatpush3.msra.mxu1 %v5494_v40  ;;  %6259 = vmatpush3.msra.mxu0 %v5558_v41  ;;  %v5885_v40 = vld [vmem:[%s6713_s1 + $0x1c0] sm:$0xff]   ;;  %v2953_v41 = vrot.slane %v7105_v42, %v1432_v35  ;;  %v5506_v51 = vunpack.c.h.bf16 %v5869_v39  ;;  %v3349_v42 = vpop.f32.mrf.mxu1 }
 0x568   : > { %6225 = vmatprep.subr.mxu1 %v5525_v46  ;;  %6260 = vmatprep.subr.mxu0 %v5589_v47  ;;  %v5509_v46 = vunpack.c.l.bf16 %v5870_v22  ;;  %v5573_v47 = vunpack.c.l.bf16 %v5886_v23  ;;  %v5570_v36 = vunpack.c.h.bf16 %v5885_v40 }
 0x569   : > { %6226 = vmatpush3.msra.mxu1 %v5493_v50  ;;  %6261 = vmatpush3.msra.mxu0 %v5557_v57  ;;  %v7166_v50 = vld [vmem:[%s6706_s28 + $0x8] sm:$0xf]  ;;  %v5477_v57 = vunpack.c.l.bf16 %v5862_v28  ;;  %v3206_v3 = vadd.f32 %v7123_v6, %v2953_v41  ;;  %v5916_v6 = vld [vmem:[%s6713_s1 + $0x2b8] sm:$0xff]  }
 0x56a   : > { %6227 = vmatprep.subr.mxu1 %v5522_v59  ;;  %6262 = vmatprep.subr.mxu0 %v5586_v60  ;;  %v5541_v59 = vunpack.c.l.bf16 %v5878_v29  ;;  %v2973_v35 = vrot.slane %v7166_v50, %v6899_v55  ;;  %v2981_v60 = vrot.slane %v7166_v50, %v6902_v56  ;;  %v3420_v55 = vpop.f32.mrf.mxu0  ;;  %v5473_v56 = vunpack.c.l.bf16 %v5861_v48  ;;  %v5906_v29 = vld [vmem:[%s6713_s1 + $0x268] sm:$0xff]  }
 0x56b   : > { %6228 = vmatpush3.msra.mxu1 %v5490_v61  ;;  %6263 = vmatpush3.msra.mxu0 %v5554_v62  ;;  %v5474_v61 = vunpack.c.h.bf16 %v5861_v48  ;;  %v5538_v62 = vunpack.c.h.bf16 %v5877_v49  ;;  %v5693_v22 = vunpack.c.l.bf16 %v5916_v6  ;;  %v5921_v48 = vld [vmem:[%s6713_s1 + $0x2e0] sm:$0xff]  }
 0x56c   : > { %6229 = vmatprep.subr.mxu1 %v5521_v5  ;;  %6264 = vmatprep.subr.mxu0 %v5585_v54  ;;  %v5505_v5 = vunpack.c.l.bf16 %v5869_v39  ;;  %v5569_v54 = vunpack.c.l.bf16 %v5885_v40  ;;  %v3421_v7 = vadd.f32 %v3420_v55, %v2981_v60  ;;  %v5654_v40 = vunpack.c.h.bf16 %v5906_v29 }
 0x56d   : > { %6230 = vmatpush3.msra.mxu1 %v5489_v10  ;;  %6265 = vmatpush3.msra.mxu0 %v5553_v11  ;;  %v5537_v10 = vunpack.c.l.bf16 %v5877_v49  ;;  %v5900_v11 = vld [vmem:[%s6713_s1 + $0x238] sm:$0xff]   ;;  %v5653_v49 = vunpack.c.l.bf16 %v5906_v29  ;;  %v5714_v60 = vunpack.c.h.bf16 %v5921_v48 }
 0x56e   : > { %6231 = vmatprep.subr.mxu1 %v5518_v12  ;;  %6266 = vmatprep.subr.mxu0 %v5582_v13  ;;  %v3350_v12 = vadd.f32 %v3349_v42, %v2973_v35  ;;  %v5662_v13 = vunpack.c.h.bf16 %v5908_v8  ;;  %v5630_v63 = vunpack.c.h.bf16 %v5900_v11  ;;  %v5913_v35 = vld [vmem:[%s6713_s1 + $0x2a0] sm:$0xff]  }
 0x56f   : > { %6232 = vmatpush3.msra.mxu1 %v5486_v14  ;;  %6267 = vmatpush3.msra.mxu0 %v5550_v15  ;;  %v5726_v14 = vunpack.c.h.bf16 %v5924_v9  ;;  %v3427_v15 = vmax.f32 %v3206_v3, 0.0  ;;  %v5904_v3 = vld [vmem:[%s6713_s1 + $0x258] sm:$0xff]  }
 0x570   : > { %6233 = vmatprep.subr.mxu1 %v5517_v16  ;;  %6268 = vmatprep.subr.mxu0 %v5581_v17  ;;  %v5694_v16 = vunpack.c.h.bf16 %v5916_v6  ;;  %v5907_v17 = vld [vmem:[%s6713_s1 + $0x270] sm:$0xff]   ;;  %v3432_v1 = vmax.f32 %v3350_v12, 0.0 }
 0x571   : > { %6234 = vmatpush3.msra.mxu1 %v5485_v19  ;;  %6269 = vmatpush3.msra.mxu0 %v5549_v20  ;;  %v5661_v19 = vunpack.c.l.bf16 %v5908_v8  ;;  %v5725_v20 = vunpack.c.l.bf16 %v5924_v9  ;;  %v5658_v23 = vunpack.c.h.bf16 %v5907_v17  ;;  %v5912_v8 = vld [vmem:[%s6713_s1 + $0x298] sm:$0xff]  }
 0x572   : > { %6235 = vmatprep.subr.mxu1 %v5514_v24  ;;  %6270 = vmatprep.subr.mxu0 %v5578_v45  ;;  %v5899_v24 = vld [vmem:[%s6713_s1 + $0x230] sm:$0xff]   ;;  %v5678_v6 = vunpack.c.h.bf16 %v5912_v8 }
 0x573   : > { %6236 = vmatpush3.msra.mxu1 %v5482_v58  ;;  %6271 = vmatpush3.msra.mxu0 %v5546_v25  ;;  %v5915_v45 = vld [vmem:[%s6713_s1 + $0x2b0] sm:$0xff]   ;;  %v3434_v58 = vmax.f32 %v3421_v7, 0.0  ;;  %v5629_v25 = vunpack.c.l.bf16 %v5900_v11  ;;  %v5710_v11 = vunpack.c.h.bf16 %v5920_v4 }
 0x574   : > { %6237 = vmatprep.subr.mxu1 %v5513_v26  ;;  %6272 = vmatprep.subr.mxu0 %v5577_v27  ;;  %v5722_v26 = vunpack.c.h.bf16 %v5923_v18  ;;  %v5626_v27 = vunpack.c.h.bf16 %v5899_v24  ;;  %v5690_v28 = vunpack.c.h.bf16 %v5915_v45  ;;  %v5689_v39 = vunpack.c.l.bf16 %v5915_v45  ;;  %v5903_v7 = vld [vmem:[%s6713_s1 + $0x250] sm:$0xff]   ;;  %v5918_v45 = vld [vmem:[%s6713_s1 + $0x2c8] sm:$0xff]  }
 0x575   : > { %6238 = vmatpush3.msra.mxu1 %v5481_v30  ;;  %6273 = vmatpush3.msra.mxu0 %v5545_v31  ;;  %v5922_v30 = vld [vmem:[%s6713_s1 + $0x2e8] sm:$0xff]   ;;  %v5657_v31 = vunpack.c.l.bf16 %v5907_v17  ;;  %v5677_v17 = vunpack.c.l.bf16 %v5912_v8  ;;  %v5702_v29 = vunpack.c.h.bf16 %v5918_v45 }
 0x576   : > { %6239 = vmatprep.subr.mxu1 %v5510_v32  ;;  %6274 = vmatprep.subr.mxu0 %v5574_v33  ;;  %v5721_v32 = vunpack.c.l.bf16 %v5923_v18  ;;  %v5898_v33 = vld [vmem:[%s6713_s1 + $0x228] sm:$0xff]   ;;  %v5718_v41 = vunpack.c.h.bf16 %v5922_v30  ;;  %v5642_v18 = vunpack.c.h.bf16 %v5903_v7 }
 0x577   : > { %6240 = vmatpush3.msra.mxu1 %v5478_v37  ;;  %6275 = vmatpush3.msra.mxu0 %v5542_v38  ;;  %v5914_v37 = vld [vmem:[%s6713_s1 + $0x2a8] sm:$0xff]   ;;  %v5625_v38 = vunpack.c.l.bf16 %v5899_v24  ;;  %v5622_v43 = vunpack.c.h.bf16 %v5898_v33 }
 0x578   : > { %6241 = vmatprep.subr.mxu1 %v5509_v46  ;;  %6276 = vmatprep.subr.mxu0 %v5573_v47  ;;  %v5686_v46 = vunpack.c.h.bf16 %v5914_v37  ;;  %v5905_v47 = vld [vmem:[%s6713_s1 + $0x260] sm:$0xff]   ;;  %v5902_v24 = vld [vmem:[%s6713_s1 + $0x248] sm:$0xff]  }
 0x579   : > { %6242 = vmatpush3.msra.mxu1 %v5477_v57  ;;  %6277 = vmatpush3.msra.mxu0 %v5541_v59  ;;  %v5717_v57 = vunpack.c.l.bf16 %v5922_v30  ;;  %v5897_v59 = vld [vmem:[%s6713_s1 + $0x220] sm:$0xff]   ;;  %v5650_v42 = vunpack.c.h.bf16 %v5905_v47  ;;  %v5649_v55 = vunpack.c.l.bf16 %v5905_v47 }
 0x57a   : > { %6243 = vmatprep.subr.mxu1 %v5506_v51  ;;  %6278 = vmatprep.subr.mxu0 %v5570_v36  ;;  %v5621_v51 = vunpack.c.l.bf16 %v5898_v33  ;;  %v5685_v36 = vunpack.c.l.bf16 %v5914_v37  ;;  %v5617_v9 = vunpack.c.l.bf16 %v5897_v59  ;;  %v5917_v33 = vld [vmem:[%s6713_s1 + $0x2c0] sm:$0xff]   ;;  %v2969_v37 = vrot.slane %v7166_v50, %v6890_v52 }
 0x57b   : > { %6244 = vmatpush3.msra.mxu1 %v5474_v61  ;;  %6279 = vmatpush3.msra.mxu0 %v5538_v62  ;;  %v5618_v61 = vunpack.c.h.bf16 %v5897_v59  ;;  %v5682_v62 = vunpack.c.h.bf16 %v5913_v35 }
 0x57c   : > { %6245 = vmatprep.subr.mxu1 %v5505_v5  ;;  %6280 = vmatprep.subr.mxu0 %v5569_v54  ;;  %v5713_v5 = vunpack.c.l.bf16 %v5921_v48  ;;  %v5896_v54 = vld [vmem:[%s6713_s1 + $0x218] sm:$0xff]  }
 0x57d   : > { %6246 = vmatpush3.msra.mxu1 %v5473_v56  ;;  %6281 = vmatpush3.msra.mxu0 %v5537_v10  ;;  %v5681_v56 = vunpack.c.l.bf16 %v5913_v35  ;;  %v5646_v10 = vunpack.c.h.bf16 %v5904_v3  ;;  %v5614_v12 = vunpack.c.h.bf16 %v5896_v54  ;;  %v5697_v35 = vunpack.c.l.bf16 %v5917_v33 }
 0x57e   : > { %4031 = vmatmul.mubr.f32.vlgmr.msra.gmra.mxu1 %v3427_v15  ;;  %4101 = vmatmul.mubr.f32.vlgmr.msra.gmra.mxu0 %v3429_v2  ;;  %v5709_v15 = vunpack.c.l.bf16 %v5920_v4  ;;  %v5895_v2 = vld [vmem:[%s6713_s1 + $0x210] sm:$0xff]  }
 0x57f   : > { %6285 = vmatprep.subr.mxu1 %v5662_v13  ;;  %6320 = vmatprep.subr.mxu0 %v5726_v14  ;;  %v5919_v13 = vld [vmem:[%s6713_s1 + $0x2d0] sm:$0xff]   ;;  %v5645_v14 = vunpack.c.l.bf16 %v5904_v3 }
 0x580   : > { %6286 = vmatpush3.msra.mxu1 %v5630_v63  ;;  %4170 = vmatprep.mubr.f32.mxu1 %v3432_v1  ;;  %v5911_v63 = vld [vmem:[%s6713_s1 + $0x290] sm:$0xff]   ;;  %v5706_v1 = vunpack.c.h.bf16 %v5919_v13 }
 0x581   : > { %6321 = vmatpush3.msra.mxu0 %v5694_v16  ;;  %4240 = vmatprep.mubr.f32.mxu0 %v3434_v58  ;;  %v5613_v16 = vunpack.c.l.bf16 %v5896_v54  ;;  %v5641_v58 = vunpack.c.l.bf16 %v5903_v7 }
 0x582   : > { %6287 = vmatprep.subr.mxu1 %v5661_v19  ;;  %6322 = vmatprep.subr.mxu0 %v5725_v20  ;;  %v5610_v19 = vunpack.c.h.bf16 %v5895_v2  ;;  %v5674_v20 = vunpack.c.h.bf16 %v5911_v63 }
 0x583   : > { %6288 = vmatpush3.msra.mxu1 %v5629_v25  ;;  %6323 = vmatpush3.msra.mxu0 %v5693_v22  ;;  %v5705_v25 = vunpack.c.l.bf16 %v5919_v13  ;;  %v5894_v22 = vld [vmem:[%s6713_s1 + $0x208] sm:$0xff]  }
 0x584   : > { %6289 = vmatprep.subr.mxu1 %v5658_v23  ;;  %6324 = vmatprep.subr.mxu0 %v5722_v26  ;;  %v5910_v23 = vld [vmem:[%s6713_s1 + $0x288] sm:$0xff]   ;;  %v5609_v26 = vunpack.c.l.bf16 %v5895_v2  ;;  %v5606_v30 = vunpack.c.h.bf16 %v5894_v22 }
 0x585   : > { %6290 = vmatpush3.msra.mxu1 %v5626_v27  ;;  %6325 = vmatpush3.msra.mxu0 %v5690_v28  ;;  %v5673_v27 = vunpack.c.l.bf16 %v5911_v63  ;;  %v5638_v28 = vunpack.c.h.bf16 %v5902_v24  ;;  %v5669_v47 = vunpack.c.l.bf16 %v5910_v23 }
 0x586   : > { %6291 = vmatprep.subr.mxu1 %v5657_v31  ;;  %6326 = vmatprep.subr.mxu0 %v5721_v32  ;;  %v5670_v31 = vunpack.c.h.bf16 %v5910_v23  ;;  %v5901_v32 = vld [vmem:[%s6713_s1 + $0x240] sm:$0xff]  }
 0x587   : > { %6292 = vmatpush3.msra.mxu1 %v5625_v38  ;;  %6327 = vmatpush3.msra.mxu0 %v5689_v39  ;;  %v2977_v38 = vrot.slane %v7166_v50, %v6893_v53  ;;  %v5637_v39 = vunpack.c.l.bf16 %v5902_v24  ;;  %v5634_v48 = vunpack.c.h.bf16 %v5901_v32  ;;  %v3348_v53 = vadd.f32 %v7151_v34, %v2969_v37  ;;  %v4249_v34 = vld [vmem:[%s6728_s14 + $0x8] sm:$0x3]  ;;  %v5732_v23 = vld [vmem:[%s6738_s26] sm:$0xff]  }
 0x588   : > { %6293 = vmatprep.subr.mxu1 %v5654_v40  ;;  %6328 = vmatprep.subr.mxu0 %v5718_v41  ;;  %v5701_v40 = vunpack.c.l.bf16 %v5918_v45  ;;  %v5893_v41 = vld [vmem:[%s6713_s1 + $0x200] sm:$0xff]   ;;  %v5633_v59 = vunpack.c.l.bf16 %v5901_v32 }
 0x589   : > { %6294 = vmatpush3.msra.mxu1 %v5622_v43  ;;  %6329 = vmatpush3.msra.mxu0 %v5686_v46  ;;  %v5909_v43 = vld [vmem:[%s6713_s1 + $0x280] sm:$0xff]   ;;  %v5605_v46 = vunpack.c.l.bf16 %v5894_v22  ;;  %v5602_v52 = vunpack.c.h.bf16 %v5893_v41  ;;  %v3419_v50 = vadd.f32 %v7161_v44, %v2977_v38  ;;  %v4252_v44 = vunpack.c.l.bf16 %v4249_v34 }
 0x58a   : > { %6295 = vmatprep.subr.mxu1 %v5653_v49  ;;  %6330 = vmatprep.subr.mxu0 %v5717_v57  ;;  %v5698_v49 = vunpack.c.h.bf16 %v5917_v33  ;;  %v5666_v57 = vunpack.c.h.bf16 %v5909_v43  ;;  %v2816_v38 = vld [vmem:[#allocation2] sm:$0xff] }
 0x58b   : > { %6296 = vmatpush3.msra.mxu1 %v5621_v51  ;;  %6331 = vmatpush3.msra.mxu0 %v5685_v36  ;;  %v5601_v51 = vunpack.c.l.bf16 %v5893_v41  ;;  %v5665_v36 = vunpack.c.l.bf16 %v5909_v43 }
 0x58c   : > { %6297 = vmatprep.subr.mxu1 %v5650_v42  ;;  %6332 = vmatprep.subr.mxu0 %v5714_v60  ;;  %v3431_v42 = vmax.f32 %v3348_v53, 0.0  ;;  %v3433_v60 = vmax.f32 %v3419_v50, 0.0 }
 0x58d   : > { %6298 = vmatpush3.msra.mxu1 %v5618_v61  ;;  %6333 = vmatpush3.msra.mxu0 %v5682_v62  ;;  %v5728_v61 = vld [vmem:[%s6728_s14] sm:$0xff]  }
 0x58e   : > { %6299 = vmatprep.subr.mxu1 %v5649_v55  ;;  %6334 = vmatprep.subr.mxu0 %v5713_v5  ;;  %v5730_v62 = vunpack.c.h.bf16 %v5728_v61  ;;  %v5729_v3 = vunpack.c.l.bf16 %v5728_v61 }
 0x58f   : > { %6300 = vmatpush3.msra.mxu1 %v5617_v9  ;;  %6335 = vmatpush3.msra.mxu0 %v5681_v56  ;;  %v4935_v9 = vld [vmem:[%s7362_s11] ss:$0 sm:$0xff] }
 0x590   : > { %6301 = vmatprep.subr.mxu1 %v5646_v10  ;;  %6336 = vmatprep.subr.mxu0 %v5710_v11 }
 0x591   : > { %6302 = vmatpush3.msra.mxu1 %v5614_v12  ;;  %6337 = vmatpush3.msra.mxu0 %v5678_v6 }
 0x592   : > { %6303 = vmatprep.subr.mxu1 %v5645_v14  ;;  %6338 = vmatprep.subr.mxu0 %v5709_v15 }
 0x593   : > { %6304 = vmatpush3.msra.mxu1 %v5613_v16  ;;  %6339 = vmatpush3.msra.mxu0 %v5677_v17 }
 0x594   : > { %6305 = vmatprep.subr.mxu1 %v5642_v18  ;;  %6340 = vmatprep.subr.mxu0 %v5706_v1 }
 0x595   : > { %6306 = vmatpush3.msra.mxu1 %v5610_v19  ;;  %6341 = vmatpush3.msra.mxu0 %v5674_v20 }
 0x596   : > { %6307 = vmatprep.subr.mxu1 %v5641_v58  ;;  %6342 = vmatprep.subr.mxu0 %v5705_v25  ;;  %v4339_v25 = vld [vmem:[%s6738_s26 + $0x8] sm:$0x3] }
 0x597   : > { %6308 = vmatpush3.msra.mxu1 %v5609_v26  ;;  %6343 = vmatpush3.msra.mxu0 %v5673_v27  ;;  %v4342_v22 = vunpack.c.l.bf16 %v4339_v25  ;;  %v5734_v26 = vunpack.c.h.bf16 %v5732_v23  ;;  %v5733_v27 = vunpack.c.l.bf16 %v5732_v23 }
 0x598   : > { %6309 = vmatprep.subr.mxu1 %v5638_v28  ;;  %6344 = vmatprep.subr.mxu0 %v5702_v29  ;;  %v2815_v28 = vld [vmem:[%s1166_s6] sm:$0xff]  ;;  %v2825_v29 = vld [vmem:[#allocation3] sm:$0xff] }
 0x599   : > { %6310 = vmatpush3.msra.mxu1 %v5606_v30  ;;  %6345 = vmatpush3.msra.mxu0 %v5670_v31  ;;  %v6517_v30 = vmov 0   ;;  %v2826_v31 = vadd.f32 %v2825_v29, %v2815_v28 }
 0x59a   : > { %6311 = vmatprep.subr.mxu1 %v5637_v39  ;;  %6346 = vmatprep.subr.mxu0 %v5701_v40 }
 0x59b   : > { %6312 = vmatpush3.msra.mxu1 %v5605_v46  ;;  %6347 = vmatpush3.msra.mxu0 %v5669_v47  ;;  %2828 = vst.msk [vmem:[#allocation3] sm:$0xff] %vm2827_vm7, %v2826_v31  ;;  %v4939_v46 = vld [vmem:[%s7364_s7] ss:$0 sm:$0xff] }
 0x59c   : > { %6313 = vmatprep.subr.mxu1 %v5634_v48  ;;  %6348 = vmatprep.subr.mxu0 %v5698_v49 }
 0x59d   : > { %6314 = vmatpush3.msra.mxu1 %v5602_v52  ;;  %6349 = vmatpush3.msra.mxu0 %v5666_v57 }
 0x59e   : > { %6315 = vmatprep.subr.mxu1 %v5633_v59  ;;  %6350 = vmatprep.subr.mxu0 %v5697_v35 }
 0x59f   : > { %6316 = vmatpush3.msra.mxu1 %v5601_v51  ;;  %6351 = vmatpush3.msra.mxu0 %v5665_v36 }
 0x5a0   : > { %4171 = vmatmul.mubr.f32.vlgmr.msra.gmra.mxu1 %v3431_v42  ;;  %4241 = vmatmul.mubr.f32.vlgmr.msra.gmra.mxu0 %v3433_v60 }
 0x5a1   : > { %6388 = vmatprep.subr.mxu1 %v6514_v0  ;;  %6394 = vmatprep.mubr.msk.f32.mxu1 %vm6515_vm0, %v6514_v0 }
 0x5a2   : > { %6397 = vmatprep.subr.mxu0 %v6514_v0  ;;  %6403 = vmatprep.mubr.msk.f32.mxu0 %vm6515_vm0, %v6514_v0 }
 0x5a3   : > { %6389 = vmatpush3.msk.msra.mxu1 %vm1281_vm2, %v4252_v44  ;;  %6398 = vmatpush3.msk.msra.mxu0 %vm1281_vm2, %v4342_v22 }
 0x5a4   : > { %6390 = vmatprep.subr.mxu1 %v6514_v0  ;;  %6399 = vmatprep.subr.mxu0 %v6514_v0 }
 0x5a5   : > { %6391 = vmatpush3.msra.mxu1 %v5730_v62  ;;  %6400 = vmatpush3.msra.mxu0 %v5734_v26 }
 0x5a6   : > { %6392 = vmatprep.subr.mxu1 %v6514_v0  ;;  %6401 = vmatprep.subr.mxu0 %v6514_v0  ;;  %v4936_v0 = vld [vmem:[%s7363_s10] ss:$0 sm:$0xff] }
 0x5a7   : > { %6393 = vmatpush3.msra.mxu1 %v5729_v3  ;;  %6402 = vmatpush3.msra.mxu0 %v5733_v27 }
 0x5a8   : > { %6446 = vset.pattern.permute.xlu0 %v6517_v30 }
 0x5a9   : > { %2819 = vperm.xlu0 %6446, %v2815_v28  }
 0x61d   : > { %v6177_v4 = vpop.f32.mrf.mxu1  ;;  %v6212_v5 = vpop.f32.mrf.mxu0 }
 0x61f   : > { %v6178_v55 = vpop.f32.mrf.mxu1  ;;  %v6213_v56 = vpop.f32.mrf.mxu0 }
 0x620   : > { %v6179_v8 = vadd.f32 %v6178_v55, %v6177_v4  ;;  %v6214_v6 = vadd.f32 %v6213_v56, %v6212_v5 }
 0x622   : > { %v3893_v11 = vadd.f32 %v6179_v8, %v4935_v9 }
 0x624   : > { %v3963_v13 = vadd.f32 %v6214_v6, %v3893_v11  ;;  %v2820_v39 = vpop.permute.xlu0 %2819 }
 0x625   : > { %v2822_v41 = vmul.f32 %v2820_v39, %v7035_v21 }
 0x627   : > { %v2823_v43 = vadd.f32 %v2822_v41, %v2816_v38 }
 0x629   : > { %2824 = vst.msk [vmem:[#allocation2] sm:$0xff] %vm2768_vm5, %v2823_v43 }
 0x63e   : > { %v6247_v54 = vpop.f32.mrf.mxu1  ;;  %v6282_v12 = vpop.f32.mrf.mxu0 }
 0x640   : > { %v6248_v10 = vpop.f32.mrf.mxu1  ;;  %v6283_v14 = vpop.f32.mrf.mxu0 }
 0x641   : > { %v6249_v7 = vadd.f32 %v6248_v10, %v6247_v54  ;;  %v6284_v16 = vadd.f32 %v6283_v14, %v6282_v12 }
 0x643   : > { %v4033_v15 = vadd.f32 %v6249_v7, %v3963_v13 }
 0x645   : > { %v4103_v1 = vadd.f32 %v6284_v16, %v4033_v15 }
 0x660   : > { %v6317_v2 = vpop.f32.mrf.mxu1  ;;  %v6352_v63 = vpop.f32.mrf.mxu0 }
 0x662   : > { %v6318_v17 = vpop.f32.mrf.mxu1  ;;  %v6353_v18 = vpop.f32.mrf.mxu0 }
 0x663   : > { %v6319_v19 = vadd.f32 %v6318_v17, %v6317_v2  ;;  %v6354_v24 = vadd.f32 %v6353_v18, %v6352_v63 }
 0x665   : > { %v4173_v20 = vadd.f32 %v6319_v19, %v4103_v1 }
 0x667   : > { %v4243_v45 = vadd.f32 %v6354_v24, %v4173_v20 }
 0x669   : > { %v4246_v58 = vmax.f32 %v4243_v45, 0.0 }
 0x66b   : > { %6395 = vmatmul.mubr.msk.f32.vlgmr.msra.gmra.mxu1 %vm1277_vm3, %v4246_v58 }
 0x72b   : > { %v4332_v32 = vpop.f32.mrf.mxu1 }
 0x72c   : > { %v4333_v33 = vadd.f32 %v4936_v0, %v4332_v32 }
 0x72d   : > { %v6396_v37 = vpop.f32.mrf.mxu1 }
 0x72e   : > { %v4336_v40 = vmax.f32 %v4333_v33, 0.0 }
 0x730   : > { %6404 = vmatmul.mubr.msk.f32.vlgmr.msra.gmra.mxu0 %vm1277_vm3, %v4336_v40 }
 0x7ef   : > { %4430 = sbr.rel (%p4942_p5) target bundleno = 2375 (0x947), region = 124 }
 0x7f0   : > { %v4422_v47 = vpop.f32.mrf.mxu0 }
 0x7f1   : > { %v4423_v48 = vadd.f32 %v4939_v46, %v4422_v47 }
 0x7f2   : > { %v6405_v49 = vpop.f32.mrf.mxu0 }
 0x7f3   : > { %4426 = vst.msk [vmem:[%s1174_s27] sm:$0xff] %vm1189_vm1, %v4423_v48 }
 0x7f4   : > { %v4431_v21 = vld [vmem:[#allocation3] sm:$0xff]  ;;  %v6518_v52 = vmov 0   ;;  %v4442_v57 = vld [vmem:[%s7365_s8] sm:$0xf]  ;;  %v6519_v50 = vmov 0.0   ;;  %vm6520_vm8 = vmmov 0  }
 0x7f5   : > { %6447 = vset.pattern.permute.xlu0 %v6518_v52  ;;  %6448 = vrcp.f32 %v4431_v21  ;;  %v4443_v53 = vunpack.c.l.bf16 %v4442_v57  ;;  %6406 = vmatprep.subr.mxu0 %v6519_v50  ;;  %v4433_v35 = vld [vmem:[#allocation2] sm:$0xff]  ;;  %vm4524_vm9 = vcmask 39936  }
 0x7f6   : > { %6408 = vmatprep.mubr.msk.f32.mxu0 %vm6520_vm8, %v6519_v50  ;;  %v4943_v60 = vld [vmem:[%s7366_s2] ss:$0 sm:$0xff] }
 0x7f7   : > { %6407 = vmatpush3.msra.mxu0 %v4443_v53 }
 0x802   : > { %v6449_v59 = vpop.eup %6448 }
 0x803   : > { %4436 = vperm.xlu0 %6447, %v6449_v59  }
 0x87e   : > { %v4437_v51 = vpop.permute.xlu0 %4436 }
 0x87f   : > { %v4439_v36 = vmul.f32 %v4437_v51, %v4433_v35 }
 0x881   : > { %4440 = vst.msk [vmem:[#allocation4] sm:$0xff] %vm2768_vm5, %v4439_v36  ;;  %v4441_v42 = vmax.f32 %v4439_v36, 0.0 }
 0x883   : > { %6409 = vmatmul.mubr.msk.f32.vlgmr.msra.gmra.mxu0 %vm2768_vm5, %v4441_v42 }
 0x943   : > { %v4520_v34 = vpop.f32.mrf.mxu0 }
 0x944   : > { %v4521_v44 = vadd.f32 %v4943_v60, %v4520_v34 }
 0x945   : > { %v6410_v61 = vpop.f32.mrf.mxu0 }
 0x946   : > { %4525 = vst.msk [vmem:[#allocation6] sm:$0xff] %vm4524_vm9, %v4521_v44 }
 0x947 PF: > { %p6423_p6 = scmp.eq.s32.totalorder %s6669_s4, 1  ;;  %s6521_s29 = smov [#allocation4]  }
 0x948   : > { %s4547_s5 = sshll.u32 %s6521_s29, 4  ;;  %s6522_s13 = smov [#allocation6]   ;;  %s4548_s5 = int_to_ptr.vmem [resolvable:$true] %s4547_s5 }
 0x949   : > { %s4558_s28 = sshll.u32 %s6522_s13, 4  ;;  %s6450_s1 = scalar_lea.vmem %s4548_s5, 128  ;;  %s4559_s28 = int_to_ptr.vmem [resolvable:$true] %s4558_s28 }
 0x94a   : > { %p6451_p7 = scmp.ne.s32.totalorder %s4548_s5, %s6450_s1  ;;  %p6457_p10 = scmp.lt.s32.totalorder %s4548_s5, %s4548_s5 }
 0x94b   : > { %p6458_p11 = scmp.lt.s32.totalorder %s6450_s1, %s6450_s1 }
 0x94c   : > { %p6452_p8 = pnand %p6451_p7, %p6423_p6 }
 0x94d   : > { %p6459_p12 = por %p6458_p11, %p6457_p10 }
 0x94e   : > { %p6453_p9 = pneg %p6452_p8 }
 0x950   : > { %p6460_p13 = pnand %p6459_p12, %p6453_p9 }
 0x952   : > { %6463 = shalt.err (!%p6460_p13)
}
 0x953   : > { %s7367_s17 = sld [smem:[#allocation29_spill]]  ;;  %s6474_s26 = scalar_lea.vmem %s4559_s28, 128 }
 0x954   : > { %p6475_p0 = scmp.ne.s32.totalorder %s4559_s28, %s6474_s26  ;;  %p6481_p3 = scmp.lt.s32.totalorder %s4559_s28, %s4559_s28 }
 0x955   : > { %p6482_p4 = scmp.lt.s32.totalorder %s6474_s26, %s6474_s26 }
 0x956   : > { %p6476_p1 = pnand %p6475_p0, %p6423_p6 }
 0x957   : > { %p6483_p5 = por %p6482_p4, %p6481_p3 }
 0x958   : > { %p6477_p2 = pneg %p6476_p1 }
 0x959   : > { %6416 = dma.vmem_to_hbm [thread:$0]  (%p6423_p6), %s4548_s5, 128, %s7367_s17, [#allocation5]  }
 0x95a   : > { %p6484_p7 = pnand %p6483_p5, %p6477_p2 }
 0x95c   : > { %6487 = shalt.err (!%p6484_p7)
}
 0x95d   : > { %s7368_s6 = sld [smem:[#allocation30_spill]] }
 0x963   : > { %6418 = dma.vmem_to_hbm [thread:$0]  (%p6423_p6), %s4559_s28, 128, %s7368_s6, [#allocation7]  }
 0x964   : > { %6503 = dma.done.wait (%p6423_p6), [#allocation5], 128  }
 0x965   : > { %6505 = vsyncadd (%p6423_p6), [#allocation5], 4294967168 }
 0x966   : > { %6507 = dma.done.wait (%p6423_p6), [#allocation7], 128  }
 0x967   : > { %6509 = vsyncadd (%p6423_p6), [#allocation7], 4294967168 }
 0x968 PF: > { %s7369_s15 = sld [smem:[#allocation10_spill]] }
 0x96e   : > { %s40_s7 = sadd.s32 1, %s7369_s15  }
 0x96f   : > { %p37_p8 = scmp.ge.s32.totalorder %s40_s7, 4  }
 0x971   :  { %39 = sbr.rel (!%p37_p8) target bundleno = 23 (0x17), region = 246 }
 0x976   :  { %4589 = vsyncpa [#allocation5], 1 }
 0x977   :  { %4591 = vsyncpa [#allocation5 + $0x1], 1 }
 0x978   :  { %4592 = vsyncpa [#allocation7], 1 }

</bundles_post_ra>
